<compile_context>
chip_gen: v6e
topology: v6e:2x2x1
jax: 0.10.0
libtpu: 0.0.40
codegen_flags: <defaults>
</compile_context>

<pallas_src>
import functools

import jax
import jax.numpy as jnp
from jax import lax
from jax.experimental import pallas as pl
from jax.experimental.pallas import tpu as pltpu


def _graph_loss_kernel(adj_ref, feat_ref, out_ref, acc_ref, *,
                       smoothness_ratio, degree_ratio, sparsity_ratio,
                       n, tm, masked):
    s = pl.program_id(0)
    t = pl.program_id(1)
    nt = pl.num_programs(1)

    @pl.when(t == 0)
    def _init():
        acc_ref[...] = jnp.zeros_like(acc_ref)

    tile_idx = s * nt + t
    row_start = pl.multiple_of(tile_idx * tm, tm)

    adj_raw = adj_ref[...]                                         # (TM, N)

    # Degrees (full row is in the block, so the reduction is exact before log).
    deg = jnp.sum(adj_raw, axis=-1, keepdims=True,
                  dtype=jnp.float32)                               # (TM, 1)

    # A_tile @ F on the MXU (native operand dtype, f32 accumulation). When the
    # resident F is row-padded, slice back to the true contraction length.
    if masked:
        f_mm = feat_ref[0:n, :]
    else:
        f_mm = feat_ref[...]
    af = jnp.dot(adj_raw, f_mm, preferred_element_type=jnp.float32)  # (TM, D)

    # Matching (TM, D) rows of F sliced from the resident copy (no extra DMA).
    feat_t = feat_ref[pl.ds(row_start, tm), :].astype(jnp.float32)

    # trace(F^T L F) row partials: deg_i*sum_d F_id^2 - sum_d F_id (A F)_id.
    ff = jnp.sum(feat_t * feat_t, axis=-1, keepdims=True)
    fa = jnp.sum(feat_t * af, axis=-1, keepdims=True)
    smooth_row = deg * ff - fa                                     # (TM, 1)

    total = float(n * n)
    per_row = (smoothness_ratio / total) * smooth_row
    if degree_ratio != 0.0:                                        # trace-time const
        per_row = per_row + (-degree_ratio / float(n)) * jnp.log(deg + 1e-12)
    if sparsity_ratio != 0.0:                                      # trace-time const
        sq = jnp.sum(adj_raw.astype(jnp.float32) ** 2, axis=-1, keepdims=True)
        per_row = per_row + (sparsity_ratio / total) * sq

    if masked:
        # Rows past N (partial last tile) carry garbage -> zero them out.
        row_ids = row_start + lax.broadcasted_iota(jnp.int32, (tm, 1), 0)
        per_row = jnp.where(row_ids < n, per_row, 0.0)

    # Stage-1 reduction: accumulate per-row partials across row tiles.
    acc_ref[...] += per_row

    # Stage-2 reduction (single cross-lane/sublane reduce) only at the end.
    @pl.when(t == nt - 1)
    def _finalize():
        out_ref[...] = jnp.broadcast_to(
            jnp.sum(acc_ref[...]), out_ref.shape).astype(out_ref.dtype)


def _vmem_capacity_bytes():
    try:
        return int(pltpu.get_tpu_info().vmem_capacity_bytes)
    except Exception:
        return 64 * 1024 * 1024  # conservative (v7x per-TC VMEM)


def _pick_row_tile(n, adj_itemsize, feat_bytes, vmem_cap):
    """Largest dtype-aligned row tile whose double-buffered A stream (plus one
    f32-sized compute temp) fits in ~half the VMEM left after the resident F,
    preferring >= 2 row tiles so the A DMA overlaps compute."""
    slack = 6 * 1024 * 1024
    budget = max(int(0.5 * (vmem_cap - feat_bytes - slack)), 2 * 1024 * 1024)
    min_tm = max(8, 32 // max(1, adj_itemsize))      # 8 f32 / 16 bf16 / 32 int8
    per_row_bytes = n * (2 * adj_itemsize + 4)       # 2 A buffers + 1 f32 temp
    cands = [c for c in (2048, 1024, 512, 256, 128, 64, 32, 16, 8)
             if c >= min_tm]
    fitting = [c for c in cands if c * per_row_bytes <= budget]
    if not fitting:
        return min_tm
    multi = [c for c in fitting if c < n]            # => cdiv(n, c) >= 2
    if multi:
        return multi[0]                               # largest with >= 2 tiles
    return fitting[-1]                                # tiny N: single padded tile


def graph_loss(out_adj, features, *, smoothness_ratio=0.2, degree_ratio=0.0,
               sparsity_ratio=0.0):
    """Scalar graph regularization loss. out_adj: (N, N), features: (N, D)."""
    N, N2 = out_adj.shape
    assert N == N2, "out_adj must be square"
    Nf, D = features.shape
    assert Nf == N, "features rows must match adjacency size"

    adj_item = out_adj.dtype.itemsize
    feat_item = features.dtype.itemsize
    vmem_cap = _vmem_capacity_bytes()

    tm = _pick_row_tile(N, adj_item, N * D * feat_item, vmem_cap)
    n_tiles = pl.cdiv(N, tm)
    n_pad = n_tiles * tm
    masked = (n_pad != N)

    # Row-pad F once (cheap, (N_pad - N) * D) so the in-kernel row slice of the
    # resident F is always in bounds; padded rows are masked out of the loss.
    feat_in = features
    if masked:
        feat_in = jnp.pad(features, ((0, n_pad - N), (0, 0)))

    # Split row tiles across both TCs only when every split keeps >= 2 tiles
    # of DMA/compute overlap.
    ns = 2 if (n_tiles % 2 == 0 and n_tiles >= 4) else 1
    nt = n_tiles // ns

    kernel = functools.partial(
        _graph_loss_kernel,
        smoothness_ratio=float(smoothness_ratio),
        degree_ratio=float(degree_ratio),
        sparsity_ratio=float(sparsity_ratio),
        n=N, tm=tm, masked=masked)

    # VMEM estimate (conservative: F counted double-buffered in case the
    # single-buffer request falls back), clamped to the device capacity.
    feat_bytes = n_pad * D * feat_item
    vmem_bytes = 2 * feat_bytes + tm * N * (2 * adj_item + 4) + (8 << 20)
    vmem_limit = int(min(vmem_cap, max(vmem_bytes, 32 << 20)))

    def build(f_spec_extra):
        return pl.pallas_call(
            kernel,
            out_shape=jax.ShapeDtypeStruct((ns, 8, 128), jnp.float32),
            grid_spec=pltpu.PrefetchScalarGridSpec(
                num_scalar_prefetch=0,
                grid=(ns, nt),
                in_specs=[
                    # Row tile of A: block index advances every step -> pipelined.
                    pl.BlockSpec((tm, N), lambda s, t: (s * nt + t, 0)),
                    # Full F: same block every step -> fetched once, resident.
                    pl.BlockSpec((n_pad, D), lambda s, t: (0, 0), **f_spec_extra),
                ],
                out_specs=pl.BlockSpec((1, 8, 128), lambda s, t: (s, 0, 0)),
                scratch_shapes=[pltpu.VMEM((tm, 1), jnp.float32)],
            ),
            compiler_params=pltpu.CompilerParams(
                dimension_semantics=("parallel", "arbitrary"),
                vmem_limit_bytes=vmem_limit),
        )

    try:
        # Resident F is fetched exactly once -> single buffer saves N*D VMEM.
        partials = build(dict(pipeline_mode=pl.Buffered(1)))(out_adj, feat_in)
    except Exception:
        # Fallback: default (double-buffered) resident F.
        partials = build({})(out_adj, feat_in)

    return jnp.sum(partials[:, 0, 0])


def _graph_loss_ref(out_adj, features, smoothness_ratio=0.2, degree_ratio=0.0,
                    sparsity_ratio=0.0):
    """Pure-JAX reference mirroring the PyTorch forward exactly."""
    a = out_adj.astype(jnp.float32)
    f = features.astype(jnp.float32)
    n = a.shape[-1]
    total = a.shape[0] * a.shape[1]
    L = jnp.diag(jnp.sum(a, -1)) - a
    loss = smoothness_ratio * jnp.trace(f.T @ (L @ f)) / total
    ones = jnp.ones((n, 1), jnp.float32)
    deg = a @ ones
    loss += -degree_ratio * jnp.sum(jnp.log(deg + 1e-12)) / n
    loss += sparsity_ratio * jnp.sum(a ** 2) / total
    return loss


if __name__ == "__main__":
    key = jax.random.PRNGKey(0)
    k_adj, k_feat, k_adj2, k_feat2 = jax.random.split(key, 4)

    # Divisible / aligned case (module-typical): N=256 nodes, D=128 features.
    N, D = 256, 128
    out_adj = jax.random.uniform(k_adj, (N, N), dtype=jnp.float32)
    features = jax.random.normal(k_feat, (N, D), dtype=jnp.float32)

    # Module defaults: smoothness_ratio=0.2, degree_ratio=0, sparsity_ratio=0.
    res0 = jax.block_until_ready(graph_loss(out_adj, features,
                                            smoothness_ratio=0.2,
                                            degree_ratio=0.0,
                                            sparsity_ratio=0.0))
    ref0 = _graph_loss_ref(out_adj, features, 0.2, 0.0, 0.0)
    assert jnp.allclose(res0, ref0, rtol=1e-3, atol=1e-3), (res0, ref0)

    # All three loss terms active.
    res1 = jax.block_until_ready(graph_loss(out_adj, features,
                                            smoothness_ratio=0.2,
                                            degree_ratio=0.1,
                                            sparsity_ratio=0.05))
    ref1 = _graph_loss_ref(out_adj, features, 0.2, 0.1, 0.05)
    assert jnp.allclose(res1, ref1, rtol=1e-3, atol=1e-3), (res1, ref1)

    # Non-divisible N (masked last row tile), all terms active.
    N2, D2 = 200, 128
    out_adj2 = jax.random.uniform(k_adj2, (N2, N2), dtype=jnp.float32)
    features2 = jax.random.normal(k_feat2, (N2, D2), dtype=jnp.float32)
    res2 = jax.block_until_ready(graph_loss(out_adj2, features2,
                                            smoothness_ratio=0.2,
                                            degree_ratio=0.1,
                                            sparsity_ratio=0.05))
    ref2 = _graph_loss_ref(out_adj2, features2, 0.2, 0.1, 0.05)
    assert jnp.allclose(res2, ref2, rtol=1e-3, atol=1e-3), (res2, ref2)

    print("KERNEL_OK")
</pallas_src>

<mosaic_0001>
module attributes {stable_mosaic.version = 11 : i64} {
  func.func @_graph_loss_kernel(%arg0: i32, %arg1: i32, %arg2: memref<128x256xf32, #tpu.memory_space<vmem>>, %arg3: memref<256x128xf32, #tpu.memory_space<vmem>>, %arg4: memref<1x8x128xf32, #tpu.memory_space<vmem>>, %arg5: memref<128x1xf32, #tpu.memory_space<vmem>>) attributes {dimension_semantics = [#tpu.dimension_semantics<parallel>, #tpu.dimension_semantics<arbitrary>], iteration_bounds = array<i64: 1, 2>, scalar_prefetch = 0 : i64, scratch_operands = 1 : i64, tpu.core_type = #tpu.core_type<tc>, window_params = [{transform_indices = @transform_0, window_bounds = array<i64: 128, 256>}, {pipeline_mode = #tpu.pipeline_mode<synchronous>, transform_indices = @transform_1, window_bounds = array<i64: 256, 128>}, {transform_indices = @transform_2, window_bounds = array<i64: 1, 8, 128>}]} {
    %c0_i32 = arith.constant 0 : i32
    %0 = arith.cmpi eq, %arg1, %c0_i32 : i32
    %1 = arith.extui %0 : i1 to i32
    %c0_i32_0 = arith.constant 0 : i32
    %2 = arith.cmpi ne, %1, %c0_i32_0 : i32
    scf.if %2 {
      %cst_14 = arith.constant 0.000000e+00 : f32
      %30 = vector.broadcast %cst_14 : f32 to vector<128x1xf32>
      %c0_15 = arith.constant 0 : index
      %c0_16 = arith.constant 0 : index
      %31 = vector.load %arg5[%c0_15, %c0_16] : memref<128x1xf32, #tpu.memory_space<vmem>>, vector<128x1xf32>
      tpu.vector_store %arg5[%c0_15, %c0_16], %30 {strides = array<i32>} : memref<128x1xf32, #tpu.memory_space<vmem>>, vector<128x1xf32>,
    } else {
    }
    %c2_i32 = arith.constant 2 : i32
    %3 = arith.muli %arg0, %c2_i32 : i32
    %4 = arith.addi %3, %arg1 : i32
    %c128_i32 = arith.constant 128 : i32
    %5 = arith.muli %4, %c128_i32 : i32
    %6 = tpu.assume_multiple %5, 128 : i32
    %c0 = arith.constant 0 : index
    %c0_1 = arith.constant 0 : index
    %7 = vector.load %arg2[%c0, %c0_1] : memref<128x256xf32, #tpu.memory_space<vmem>>, vector<128x256xf32>
    %cst = arith.constant dense<0.000000e+00> : vector<128xf32>
    %8 = vector.multi_reduction <add>, %7, %cst [1] : vector<128x256xf32> to vector<128xf32>
    %9 = vector.shape_cast %8 : vector<128xf32> to vector<128x1xf32>
    %c0_2 = arith.constant 0 : index
    %c0_3 = arith.constant 0 : index
    %10 = vector.load %arg3[%c0_2, %c0_3] : memref<256x128xf32, #tpu.memory_space<vmem>>, vector<256x128xf32>
    %cst_4 = arith.constant dense<0.000000e+00> : vector<128x128xf32>
    %11 = tpu.matmul %7, %10, %cst_4 {dimension_numbers = #tpu.dot_dimension_numbers<[1], [0], [0], [1], [0, 0, 1, 1], [], []>} : vector<128x256xf32>, vector<256x128xf32>, vector<128x128xf32> -> vector<128x128xf32>
    %12 = arith.index_cast %6 : i32 to index
    %c0_5 = arith.constant 0 : index
    %13 = vector.load %arg3[%12, %c0_5] : memref<256x128xf32, #tpu.memory_space<vmem>>, vector<128x128xf32>
    %14 = arith.mulf %13, %13 : vector<128x128xf32>
    %cst_6 = arith.constant dense<0.000000e+00> : vector<128xf32>
    %15 = vector.multi_reduction <add>, %14, %cst_6 [1] : vector<128x128xf32> to vector<128xf32>
    %16 = vector.shape_cast %15 : vector<128xf32> to vector<128x1xf32>
    %17 = arith.mulf %13, %11 : vector<128x128xf32>
    %cst_7 = arith.constant dense<0.000000e+00> : vector<128xf32>
    %18 = vector.multi_reduction <add>, %17, %cst_7 [1] : vector<128x128xf32> to vector<128xf32>
    %19 = vector.shape_cast %18 : vector<128xf32> to vector<128x1xf32>
    %20 = arith.mulf %9, %16 : vector<128x1xf32>
    %21 = arith.subf %20, %19 : vector<128x1xf32>
    %cst_8 = arith.constant 3.05175786E-6 : f32
    %22 = vector.broadcast %cst_8 : f32 to vector<128x1xf32>
    %23 = arith.mulf %22, %21 : vector<128x1xf32>
    %c0_9 = arith.constant 0 : index
    %c0_10 = arith.constant 0 : index
    %24 = vector.load %arg5[%c0_9, %c0_10] : memref<128x1xf32, #tpu.memory_space<vmem>>, vector<128x1xf32>
    %25 = arith.addf %24, %23 : vector<128x1xf32>
    %c0_11 = arith.constant 0 : index
    %c0_12 = arith.constant 0 : index
    %26 = vector.load %arg5[%c0_11, %c0_12] : memref<128x1xf32, #tpu.memory_space<vmem>>, vector<128x1xf32>
    tpu.vector_store %arg5[%c0_11, %c0_12], %25 {strides = array<i32>} : memref<128x1xf32, #tpu.memory_space<vmem>>, vector<128x1xf32>,
    %c1_i32 = arith.constant 1 : i32
    %27 = arith.cmpi eq, %arg1, %c1_i32 : i32
    %28 = arith.extui %27 : i1 to i32
    %c0_i32_13 = arith.constant 0 : i32
    %29 = arith.cmpi ne, %28, %c0_i32_13 : i32
    scf.if %29 {
      %c0_14 = arith.constant 0 : index
      %c0_15 = arith.constant 0 : index
      %30 = vector.load %arg5[%c0_14, %c0_15] : memref<128x1xf32, #tpu.memory_space<vmem>>, vector<128x1xf32>
      %31 = vector.shape_cast %30 : vector<128x1xf32> to vector<1x128x1xf32>
      %cst_16 = arith.constant dense<0.000000e+00> : vector<1xf32>
      %32 = vector.multi_reduction <add>, %31, %cst_16 [1, 2] : vector<1x128x1xf32> to vector<1xf32>
      %33 = vector.shape_cast %32 : vector<1xf32> to vector<1x1x1xf32>
      %34 = vector.extract %33[0, 0, 0] : f32 from vector<1x1x1xf32>
      %35 = vector.broadcast %34 : f32 to vector<1x8x128xf32>
      %c0_17 = arith.constant 0 : index
      %c0_18 = arith.constant 0 : index
      %c0_19 = arith.constant 0 : index
      %36 = vector.load %arg4[%c0_17, %c0_18, %c0_19] : memref<1x8x128xf32, #tpu.memory_space<vmem>>, vector<1x8x128xf32>
      tpu.vector_store %arg4[%c0_17, %c0_18, %c0_19], %35 {strides = array<i32>} : memref<1x8x128xf32, #tpu.memory_space<vmem>>, vector<1x8x128xf32>,
    } else {
    }
    return
  }
  func.func @transform_0(%arg0: i32, %arg1: i32) -> (i32, i32) {
    %c2_i32 = arith.constant 2 : i32
    %0 = arith.muli %arg0, %c2_i32 : i32
    %1 = arith.addi %0, %arg1 : i32
    %c0_i32 = arith.constant 0 : i32
    %c0_i32_0 = arith.constant 0 : i32
    return %1, %c0_i32 : i32, i32
  }
  func.func @transform_1(%arg0: i32, %arg1: i32) -> (i32, i32) {
    %c0_i32 = arith.constant 0 : i32
    %c0_i32_0 = arith.constant 0 : i32
    %c0_i32_1 = arith.constant 0 : i32
    return %c0_i32, %c0_i32_0 : i32, i32
  }
  func.func @transform_2(%arg0: i32, %arg1: i32) -> (i32, i32, i32) {
    %c0_i32 = arith.constant 0 : i32
    %c0_i32_0 = arith.constant 0 : i32
    %c0_i32_1 = arith.constant 0 : i32
    return %arg0, %c0_i32, %c0_i32_0 : i32, i32, i32
  }
}

module attributes {stable_mosaic.version = 11 : i64} {
  func.func @_graph_loss_kernel(%arg0: i32, %arg1: i32, %arg2: memref<128x256xf32, #tpu.memory_space<vmem>>, %arg3: memref<256x128xf32, #tpu.memory_space<vmem>>, %arg4: memref<1x8x128xf32, #tpu.memory_space<vmem>>, %arg5: memref<128x1xf32, #tpu.memory_space<vmem>>) attributes {dimension_semantics = [#tpu.dimension_semantics<parallel>, #tpu.dimension_semantics<arbitrary>], iteration_bounds = array<i64: 1, 2>, scalar_prefetch = 0 : i64, scratch_operands = 1 : i64, tpu.core_type = #tpu.core_type<tc>, window_params = [{transform_indices = @transform_0, window_bounds = array<i64: 128, 256>}, {pipeline_mode = #tpu.pipeline_mode<synchronous>, transform_indices = @transform_1, window_bounds = array<i64: 256, 128>}, {transform_indices = @transform_2, window_bounds = array<i64: 1, 8, 128>}]} {
    %c0_i32 = arith.constant 0 : i32
    %0 = arith.cmpi eq, %arg1, %c0_i32 : i32
    %1 = arith.extui %0 : i1 to i32
    %c0_i32_0 = arith.constant 0 : i32
    %2 = arith.cmpi ne, %1, %c0_i32_0 : i32
    scf.if %2 {
      %cst_14 = arith.constant 0.000000e+00 : f32
      %30 = vector.broadcast %cst_14 : f32 to vector<128x1xf32>
      %c0_15 = arith.constant 0 : index
      %c0_16 = arith.constant 0 : index
      %31 = vector.load %arg5[%c0_15, %c0_16] : memref<128x1xf32, #tpu.memory_space<vmem>>, vector<128x1xf32>
      tpu.vector_store %arg5[%c0_15, %c0_16], %30 {strides = array<i32>} : memref<128x1xf32, #tpu.memory_space<vmem>>, vector<128x1xf32>,
    } else {
    }
    %c2_i32 = arith.constant 2 : i32
    %3 = arith.muli %arg0, %c2_i32 : i32
    %4 = arith.addi %3, %arg1 : i32
    %c128_i32 = arith.constant 128 : i32
    %5 = arith.muli %4, %c128_i32 : i32
    %6 = tpu.assume_multiple %5, 128 : i32
    %c0 = arith.constant 0 : index
    %c0_1 = arith.constant 0 : index
    %7 = vector.load %arg2[%c0, %c0_1] : memref<128x256xf32, #tpu.memory_space<vmem>>, vector<128x256xf32>
    %cst = arith.constant dense<0.000000e+00> : vector<128xf32>
    %8 = vector.multi_reduction <add>, %7, %cst [1] : vector<128x256xf32> to vector<128xf32>
    %9 = vector.shape_cast %8 : vector<128xf32> to vector<128x1xf32>
    %c0_2 = arith.constant 0 : index
    %c0_3 = arith.constant 0 : index
    %10 = vector.load %arg3[%c0_2, %c0_3] : memref<256x128xf32, #tpu.memory_space<vmem>>, vector<256x128xf32>
    %cst_4 = arith.constant dense<0.000000e+00> : vector<128x128xf32>
    %11 = tpu.matmul %7, %10, %cst_4 {dimension_numbers = #tpu.dot_dimension_numbers<[1], [0], [0], [1], [0, 0, 1, 1], [], []>} : vector<128x256xf32>, vector<256x128xf32>, vector<128x128xf32> -> vector<128x128xf32>
    %12 = arith.index_cast %6 : i32 to index
    %c0_5 = arith.constant 0 : index
    %13 = vector.load %arg3[%12, %c0_5] : memref<256x128xf32, #tpu.memory_space<vmem>>, vector<128x128xf32>
    %14 = arith.mulf %13, %13 : vector<128x128xf32>
    %cst_6 = arith.constant dense<0.000000e+00> : vector<128xf32>
    %15 = vector.multi_reduction <add>, %14, %cst_6 [1] : vector<128x128xf32> to vector<128xf32>
    %16 = vector.shape_cast %15 : vector<128xf32> to vector<128x1xf32>
    %17 = arith.mulf %13, %11 : vector<128x128xf32>
    %cst_7 = arith.constant dense<0.000000e+00> : vector<128xf32>
    %18 = vector.multi_reduction <add>, %17, %cst_7 [1] : vector<128x128xf32> to vector<128xf32>
    %19 = vector.shape_cast %18 : vector<128xf32> to vector<128x1xf32>
    %20 = arith.mulf %9, %16 : vector<128x1xf32>
    %21 = arith.subf %20, %19 : vector<128x1xf32>
    %cst_8 = arith.constant 3.05175786E-6 : f32
    %22 = vector.broadcast %cst_8 : f32 to vector<128x1xf32>
    %23 = arith.mulf %22, %21 : vector<128x1xf32>
    %c0_9 = arith.constant 0 : index
    %c0_10 = arith.constant 0 : index
    %24 = vector.load %arg5[%c0_9, %c0_10] : memref<128x1xf32, #tpu.memory_space<vmem>>, vector<128x1xf32>
    %25 = arith.addf %24, %23 : vector<128x1xf32>
    %c0_11 = arith.constant 0 : index
    %c0_12 = arith.constant 0 : index
    %26 = vector.load %arg5[%c0_11, %c0_12] : memref<128x1xf32, #tpu.memory_space<vmem>>, vector<128x1xf32>
    tpu.vector_store %arg5[%c0_11, %c0_12], %25 {strides = array<i32>} : memref<128x1xf32, #tpu.memory_space<vmem>>, vector<128x1xf32>,
    %c1_i32 = arith.constant 1 : i32
    %27 = arith.cmpi eq, %arg1, %c1_i32 : i32
    %28 = arith.extui %27 : i1 to i32
    %c0_i32_13 = arith.constant 0 : i32
    %29 = arith.cmpi ne, %28, %c0_i32_13 : i32
    scf.if %29 {
      %c0_14 = arith.constant 0 : index
      %c0_15 = arith.constant 0 : index
      %30 = vector.load %arg5[%c0_14, %c0_15] : memref<128x1xf32, #tpu.memory_space<vmem>>, vector<128x1xf32>
      %31 = vector.shape_cast %30 : vector<128x1xf32> to vector<1x128x1xf32>
      %cst_16 = arith.constant dense<0.000000e+00> : vector<1xf32>
      %32 = vector.multi_reduction <add>, %31, %cst_16 [1, 2] : vector<1x128x1xf32> to vector<1xf32>
      %33 = vector.shape_cast %32 : vector<1xf32> to vector<1x1x1xf32>
      %34 = vector.extract %33[0, 0, 0] : f32 from vector<1x1x1xf32>
      %35 = vector.broadcast %34 : f32 to vector<1x8x128xf32>
      %c0_17 = arith.constant 0 : index
      %c0_18 = arith.constant 0 : index
      %c0_19 = arith.constant 0 : index
      %36 = vector.load %arg4[%c0_17, %c0_18, %c0_19] : memref<1x8x128xf32, #tpu.memory_space<vmem>>, vector<1x8x128xf32>
      tpu.vector_store %arg4[%c0_17, %c0_18, %c0_19], %35 {strides = array<i32>} : memref<1x8x128xf32, #tpu.memory_space<vmem>>, vector<1x8x128xf32>,
    } else {
    }
    return
  }
  func.func @transform_0(%arg0: i32, %arg1: i32) -> (i32, i32) {
    %c2_i32 = arith.constant 2 : i32
    %0 = arith.muli %arg0, %c2_i32 : i32
    %1 = arith.addi %0, %arg1 : i32
    %c0_i32 = arith.constant 0 : i32
    %c0_i32_0 = arith.constant 0 : i32
    return %1, %c0_i32 : i32, i32
  }
  func.func @transform_1(%arg0: i32, %arg1: i32) -> (i32, i32) {
    %c0_i32 = arith.constant 0 : i32
    %c0_i32_0 = arith.constant 0 : i32
    %c0_i32_1 = arith.constant 0 : i32
    return %c0_i32, %c0_i32_0 : i32, i32
  }
  func.func @transform_2(%arg0: i32, %arg1: i32) -> (i32, i32, i32) {
    %c0_i32 = arith.constant 0 : i32
    %c0_i32_0 = arith.constant 0 : i32
    %c0_i32_1 = arith.constant 0 : i32
    return %arg0, %c0_i32, %c0_i32_0 : i32, i32, i32
  }
}

</mosaic_0001>

<bundles_post_ra>
// kernel: tpu_custom_call.1
= control target key start
LH: loop header
LB: loop body
LE: loop exit
PB: predicated region body
PF: predicated region fallthrough
CT: control target
= control target key end

     0   :  { %7 = vsyncpa [#allocation4], 0  ;;  %s1547_s0 = inlined_call_operand.hbm [shape: f32[256,256], index: 0, kind: input, shape index: {}]   ;;  %s1548_s1 = inlined_call_operand.hbm [shape: f32[256,128], index: 1, kind: input, shape index: {}]   ;;  %s1549_s2 = inlined_call_operand.hbm [shape: f32[1,8,128], index: 2, kind: output, shape index: {}]  }
   0x1   :  { %9 = vsyncpa [#allocation4 + $0x1], 0 }
   0x2   :  { %10 = vsyncpa [#allocation7], 0 }
   0x3   :  { %11 = vsyncpa [#allocation5], 0  ;;  %s1204_s9 = smov 0   ;;  %s1206_s10 = smov 0  }
   0x4   :  { %s1208_s11 = smov 0   ;;  %s1210_s12 = smov 0  }
   0x5   :  { %s1212_s13 = smov 0   ;;  %s1214_s14 = smov 0  }
   0x6 LB: > { %s831_s15 = sadd.s32 4294967295, %s1179_s14   ;;  %p53_p0 = scmp.ne.s32.totalorder %s1163_s10, %s1159_s9  ;;  %s1179_s14 = sphi %s1214_s14, %s17_s14   ;;  %s1175_s13 = sphi %s1212_s13, %s1560_s13   ;;  %s1171_s12 = sphi %s1210_s12, %s1559_s12   ;;  %s1167_s11 = sphi %s1208_s11, %s1558_s11   ;;  %s1163_s10 = sphi %s1206_s10, %s1557_s10   ;;  %s1159_s9 = sphi %s1204_s9, %s1556_s9  }
   0x7   : > { %p1236_p1 = scmp.eq.s32.totalorder %s831_s15, 0  ;;  %p832_p2 = scmp.ge.s32.totalorder %s1179_s14, 1 }
   0x8   : > { %p111_p3 = scmp.lt.s32.totalorder %s1179_s14, 3  ;;  %s1181_s19 = smov [#allocation6]  }
   0x9   : > { %p1244_p4 = por %p1236_p1, %p53_p0  ;;  %s123_s20 = sshll.u32 %s1181_s19, 4  ;;  %s124_s20 = int_to_ptr.vmem [resolvable:$true] %s123_s20 }
   0xa   : > { %p1248_p5 = pnand %p832_p2, %p111_p3  ;;  %s26_s22 = sadd.s32 1, %s1175_s13 }
   0xb   : > { %s1054_s23 = scalar_lea.vmem %s124_s20, 4096  ;;  %p1062_p12 = scmp.lt.s32.totalorder %s124_s20, %s124_s20 }
   0xc   : > { %p975_p6 = pneg %p1248_p5  ;;  %p1055_p9 = scmp.ne.s32.totalorder %s124_s20, %s1054_s23 }
   0xd   : > { %p1063_p13 = scmp.lt.s32.totalorder %s1054_s23, %s1054_s23 }
   0xe   : > { %p1256_p7 = pnand %p975_p6, %p1236_p1 }
   0xf   : > { %p1064_p0 = por %p1063_p13, %p1062_p12 }
  0x10   : > { %p1045_p8 = pneg %p1256_p7 }
  0x12   : > { %p1057_p10 = pnand %p1055_p9, %p1045_p8 }
  0x14   : > { %p1058_p11 = pneg %p1057_p10 }
  0x16   : > { %p1065_p2 = pnand %p1064_p0, %p1058_p11 }
  0x18   : > { %1068 = shalt.err (!%p1065_p2)
}
  0x19   : > { %s1182_s24 = smov 128   ;;  %s1183_s25 = smov 8  }
  0x1a   : > { %978 = dma.hbm_to_vmem [thread:$0]  (!%p1256_p7), %s1548_s1, 4096, %s124_s20, [#allocation7], %s1182_s24, %s1182_s24, %s1183_s25  }
  0x1b   : > { %p27_p3 = scmp.ge.s32.totalorder %s26_s22, 2  ;;  %s40_s28 = sadd.s32 1, %s1167_s11 }
  0x1c   : > { %p47_p6 = scmp.ne.s32.totalorder %s1167_s11, %s1163_s10  ;;  %p48_p8 = scmp.eq.s32.totalorder %s1179_s14, 0 }
  0x1d   : > { %s1562_s22 = smov (%p27_p3, %s26_s22), 0  ;;  %p984_p10 = scmp.lt.s32.totalorder %s1179_s14, 2 }
  0x1e   : > { %p49_p9 = por %p48_p8, %p47_p6  ;;  %s37_s29 = ssub.s32 %s1175_s13, %s1562_s22 }
  0x1f   : > { %s137_s30 = sand.u32 1, %s1167_s11   ;;  %p38_p11 = scmp.eq.s32.totalorder %s37_s29, 0 }
  0x20   : > { %s835_s3 = sshll.u32 %s137_s30, 8  ;;  %s850_s4 = sshll.u32 %s1175_s13, 12 }
  0x21   : > { %s1280_s5 = scalar_select %p38_p11, %s1167_s11, %s40_s28  }
  0x22   : > { %s150_s8 = scalar_lea.hbm %s1547_s0, %s850_s4  ;;  %s141_s9 = scalar_lea.vmem [#allocation3], %s835_s3 }
  0x23   : > { %s151_s19 = sshll.u32 %s141_s9, 4  ;;  %p1285_p7 = pnand %p984_p10, %p49_p9  ;;  %s152_s19 = int_to_ptr.vmem [resolvable:$true] %s151_s19 }
  0x24   : > { %s138_s21 = scalar_lea.sflag [#allocation4], %s137_s30  ;;  %s1082_s23 = scalar_lea.vmem %s152_s19, 4096 }
  0x25   : > { %p1071_p12 = pneg %p1285_p7  ;;  %p1083_p13 = scmp.ne.s32.totalorder %s152_s19, %s1082_s23 }
  0x26   : > { %s1184_s24 = smov [#allocation3]  }
  0x27   : > { %p1085_p0 = pnand %p1083_p13, %p1071_p12  ;;  %s1087_s25 = sshll.u32 %s1184_s24, 4  ;;  %s1088_s25 = int_to_ptr.vmem [resolvable:$false] %s1087_s25 }
  0x28   : > { %s1089_s26 = scalar_lea.vmem %s1088_s25, 8192  ;;  %p1090_p3 = scmp.lt.s32.totalorder %s152_s19, %s1088_s25 }
  0x29   : > { %p1086_p2 = pneg %p1085_p0  ;;  %p1091_p6 = scmp.lt.s32.totalorder %s1089_s26, %s1082_s23 }
  0x2b   : > { %p1092_p8 = por %p1091_p6, %p1090_p3 }
  0x2d   : > { %p1093_p9 = pnand %p1092_p8, %p1086_p2 }
  0x2f   : > { %1096 = shalt.err (!%p1093_p9)
}
  0x30   : > { %s1185_s27 = smov 256   ;;  %s1186_s28 = smov 16  }
  0x31   : > { %982 = dma.hbm_to_vmem [thread:$0]  (!%p1285_p7), %s150_s8, 4096, %s152_s19, %s138_s21, %s1185_s27, %s1185_s27, %s1186_s28  }
  0x32   : > { %163 = sbr.rel (%p1248_p5) target bundleno = 732 (0x2dc), region = 28  ;;  %s165_s29 = sand.u32 (!%p1248_p5), 1, %s1163_s10  }
  0x33   : > { %s840_s30 = sshll.u32 (!%p1248_p5), %s165_s29, 8  ;;  %s166_s3 = scalar_lea.sflag (!%p1248_p5), [#allocation4], %s165_s29 }
  0x34   : > { %s1296_s4 = scalar_lea.vmem (!%p1248_p5), [#allocation3], %s840_s30 }
  0x37   : > { %1146 = dma.done.wait (%p1244_p4), %s166_s3, 4096  }
  0x38   : > { %1148 = vsyncadd (%p1244_p4), %s166_s3, 4294963200 }
  0x39   : > { %1150 = dma.done.wait (%p1236_p1), [#allocation7], 4096  }
  0x3a   : > { %1152 = vsyncadd (%p1236_p1), [#allocation7], 4294963200  ;;  %p842_p5 = scmp.ne.s32.totalorder %s1171_s12, 0 }
  0x3c   : > { %195 = sbr.rel (%p842_p5) target bundleno = 74 (0x4a), region = 40 }
  0x41   : > { %vm196_vm0 = vcmask 7168   ;;  %v1187_v0 = vmov 0.0  }
  0x42   : > { %197 = vst.msk [vmem:[#allocation2] sm:$0xff] %vm196_vm0, %v1187_v0  ;;  %198 = vst.msk [vmem:[#allocation2 + $0x8] sm:$0xff] %vm196_vm0, %v1187_v0 }
  0x43   : > { %199 = vst.msk [vmem:[#allocation2 + $0x10] sm:$0xff] %vm196_vm0, %v1187_v0  ;;  %200 = vst.msk [vmem:[#allocation2 + $0x18] sm:$0xff] %vm196_vm0, %v1187_v0 }
  0x44   : > { %201 = vst.msk [vmem:[#allocation2 + $0x20] sm:$0xff] %vm196_vm0, %v1187_v0  ;;  %202 = vst.msk [vmem:[#allocation2 + $0x28] sm:$0xff] %vm196_vm0, %v1187_v0 }
  0x45   : > { %203 = vst.msk [vmem:[#allocation2 + $0x30] sm:$0xff] %vm196_vm0, %v1187_v0  ;;  %204 = vst.msk [vmem:[#allocation2 + $0x38] sm:$0xff] %vm196_vm0, %v1187_v0 }
  0x46   : > { %205 = vst.msk [vmem:[#allocation2 + $0x40] sm:$0xff] %vm196_vm0, %v1187_v0  ;;  %206 = vst.msk [vmem:[#allocation2 + $0x48] sm:$0xff] %vm196_vm0, %v1187_v0 }
  0x47   : > { %207 = vst.msk [vmem:[#allocation2 + $0x50] sm:$0xff] %vm196_vm0, %v1187_v0  ;;  %208 = vst.msk [vmem:[#allocation2 + $0x58] sm:$0xff] %vm196_vm0, %v1187_v0 }
  0x48   : > { %209 = vst.msk [vmem:[#allocation2 + $0x60] sm:$0xff] %vm196_vm0, %v1187_v0  ;;  %210 = vst.msk [vmem:[#allocation2 + $0x68] sm:$0xff] %vm196_vm0, %v1187_v0 }
  0x49   : > { %211 = vst.msk [vmem:[#allocation2 + $0x70] sm:$0xff] %vm196_vm0, %v1187_v0  ;;  %212 = vst.msk [vmem:[#allocation2 + $0x78] sm:$0xff] %vm196_vm0, %v1187_v0 }
  0x4a PF: > { %v327_v1 = vld [vmem:[#allocation6 + $0xf8] sm:$0xff]  ;;  %v326_v3 = vld [vmem:[#allocation6 + $0xf0] sm:$0xff]  ;;  %v325_v5 = vld [vmem:[#allocation6 + $0xe8] sm:$0xff]  ;;  %s843_s16 = sshll.u32 %s1171_s12, 7  ;;  %vm666_vm1 = vcmask 7168   ;;  %p844_p1 = scmp.ne.s32.totalorder %s1171_s12, 1 }
  0x4b   : > { %v311_v2 = vld [vmem:[#allocation6 + $0x78] sm:$0xff]  ;;  %851 = vmatprep.subr.mxu0 %v327_v1  ;;  %931 = vmatprep.subr.mxu1 %v327_v1  ;;  %v310_v4 = vld [vmem:[#allocation6 + $0x70] sm:$0xff]  ;;  %v309_v6 = vld [vmem:[#allocation6 + $0x68] sm:$0xff]  ;;  %s1356_s17 = scalar_lea.vmem [#allocation6], %s843_s16 }
  0x4c   : > { %852 = vmatpush3.msra.mxu0 %v311_v2  ;;  %947 = vmatpush3.msra.mxu1 %v311_v2  ;;  %v324_v7 = vld [vmem:[#allocation6 + $0xe0] sm:$0xff]  ;;  %v323_v9 = vld [vmem:[#allocation6 + $0xd8] sm:$0xff]  ;;  %v322_v11 = vld [vmem:[#allocation6 + $0xd0] sm:$0xff] }
  0x4d   : > { %853 = vmatprep.subr.mxu0 %v326_v3  ;;  %932 = vmatprep.subr.mxu1 %v326_v3  ;;  %v308_v8 = vld [vmem:[#allocation6 + $0x60] sm:$0xff]  ;;  %v307_v10 = vld [vmem:[#allocation6 + $0x58] sm:$0xff]  ;;  %v306_v12 = vld [vmem:[#allocation6 + $0x50] sm:$0xff] }
  0x4e   : > { %854 = vmatpush3.msra.mxu0 %v310_v4  ;;  %948 = vmatpush3.msra.mxu1 %v310_v4  ;;  %v321_v13 = vld [vmem:[#allocation6 + $0xc8] sm:$0xff]  ;;  %v320_v15 = vld [vmem:[#allocation6 + $0xc0] sm:$0xff]  ;;  %v319_v17 = vld [vmem:[#allocation6 + $0xb8] sm:$0xff] }
  0x4f   : > { %855 = vmatprep.subr.mxu0 %v325_v5  ;;  %933 = vmatprep.subr.mxu1 %v325_v5  ;;  %v305_v14 = vld [vmem:[#allocation6 + $0x48] sm:$0xff]  ;;  %v304_v16 = vld [vmem:[#allocation6 + $0x40] sm:$0xff]  ;;  %v303_v18 = vld [vmem:[#allocation6 + $0x38] sm:$0xff] }
  0x50   : > { %856 = vmatpush3.msra.mxu0 %v309_v6  ;;  %949 = vmatpush3.msra.mxu1 %v309_v6  ;;  %v318_v19 = vld [vmem:[#allocation6 + $0xb0] sm:$0xff]  ;;  %v317_v21 = vld [vmem:[#allocation6 + $0xa8] sm:$0xff]  ;;  %v316_v23 = vld [vmem:[#allocation6 + $0xa0] sm:$0xff] }
  0x51   : > { %857 = vmatprep.subr.mxu0 %v324_v7  ;;  %934 = vmatprep.subr.mxu1 %v324_v7  ;;  %v302_v20 = vld [vmem:[#allocation6 + $0x30] sm:$0xff]  ;;  %v301_v22 = vld [vmem:[#allocation6 + $0x28] sm:$0xff]  ;;  %v300_v24 = vld [vmem:[#allocation6 + $0x20] sm:$0xff] }
  0x52   : > { %858 = vmatpush3.msra.mxu0 %v308_v8  ;;  %950 = vmatpush3.msra.mxu1 %v308_v8  ;;  %v315_v25 = vld [vmem:[#allocation6 + $0x98] sm:$0xff]  ;;  %v314_v27 = vld [vmem:[#allocation6 + $0x90] sm:$0xff]  ;;  %v313_v29 = vld [vmem:[#allocation6 + $0x88] sm:$0xff] }
  0x53   : > { %859 = vmatprep.subr.mxu0 %v323_v9  ;;  %935 = vmatprep.subr.mxu1 %v323_v9  ;;  %v299_v26 = vld [vmem:[#allocation6 + $0x18] sm:$0xff]  ;;  %v298_v28 = vld [vmem:[#allocation6 + $0x10] sm:$0xff]  ;;  %v297_v30 = vld [vmem:[#allocation6 + $0x8] sm:$0xff] }
  0x54   : > { %860 = vmatpush3.msra.mxu0 %v307_v10  ;;  %951 = vmatpush3.msra.mxu1 %v307_v10  ;;  %v312_v31 = vld [vmem:[#allocation6 + $0x80] sm:$0xff]  ;;  %v217_v32 = vld [vmem:[%s1296_s4 + $0x8] sm:$0xff]  ;;  %v219_v36 = vld [vmem:[%s1296_s4 + $0x18] sm:$0xff] }
  0x55   : > { %861 = vmatprep.subr.mxu0 %v322_v11  ;;  %936 = vmatprep.subr.mxu1 %v322_v11  ;;  %v296_v33 = vld [vmem:[#allocation6] sm:$0xff]  ;;  %v233_v35 = vld [vmem:[%s1296_s4 + $0x88] sm:$0xff]  ;;  %v235_v42 = vld [vmem:[%s1296_s4 + $0x98] sm:$0xff] }
  0x56   : > { %862 = vmatpush3.msra.mxu0 %v306_v12  ;;  %952 = vmatpush3.msra.mxu1 %v306_v12  ;;  %v216_v34 = vld [vmem:[%s1296_s4] sm:$0xff]  ;;  %v221_v37 = vld [vmem:[%s1296_s4 + $0x28] sm:$0xff]  ;;  %v218_v43 = vld [vmem:[%s1296_s4 + $0x10] sm:$0xff] }
  0x57   : > { %863 = vmatprep.subr.mxu0 %v321_v13  ;;  %937 = vmatprep.subr.mxu1 %v321_v13  ;;  %v220_v38 = vld [vmem:[%s1296_s4 + $0x20] sm:$0xff]  ;;  %v248_v39 = vadd.f32 %v217_v32, %v216_v34  ;;  %v223_v44 = vld [vmem:[%s1296_s4 + $0x38] sm:$0xff]  ;;  %v222_v45 = vld [vmem:[%s1296_s4 + $0x30] sm:$0xff]  ;;  %v251_v46 = vadd.f32 %v219_v36, %v218_v43 }
  0x58   : > { %864 = vmatpush3.msra.mxu0 %v305_v14  ;;  %953 = vmatpush3.msra.mxu1 %v305_v14  ;;  %v232_v40 = vld [vmem:[%s1296_s4 + $0x80] sm:$0xff]  ;;  %v254_v41 = vadd.f32 %v221_v37, %v220_v38  ;;  %v234_v47 = vld [vmem:[%s1296_s4 + $0x90] sm:$0xff]  ;;  %v257_v48 = vadd.f32 %v223_v44, %v222_v45  ;;  %v237_v49 = vld [vmem:[%s1296_s4 + $0xa8] sm:$0xff] }
  0x59   : > { %865 = vmatprep.subr.mxu0 %v320_v15  ;;  %938 = vmatprep.subr.mxu1 %v320_v15  ;;  %v225_v50 = vld [vmem:[%s1296_s4 + $0x48] sm:$0xff]  ;;  %v224_v51 = vld [vmem:[%s1296_s4 + $0x40] sm:$0xff]  ;;  %v227_v52 = vld [vmem:[%s1296_s4 + $0x58] sm:$0xff]  ;;  %v272_v2 = vadd.f32 %v233_v35, %v232_v40  ;;  %v275_v4 = vadd.f32 %v235_v42, %v234_v47 }
  0x5a   : > { %866 = vmatpush3.msra.mxu0 %v304_v16  ;;  %954 = vmatpush3.msra.mxu1 %v304_v16  ;;  %v226_v53 = vld [vmem:[%s1296_s4 + $0x50] sm:$0xff]  ;;  %v260_v54 = vadd.f32 %v225_v50, %v224_v51  ;;  %v236_v55 = vld [vmem:[%s1296_s4 + $0xa0] sm:$0xff]  ;;  %v239_v57 = vld [vmem:[%s1296_s4 + $0xb8] sm:$0xff] }
  0x5b   : > { %867 = vmatprep.subr.mxu0 %v319_v17  ;;  %939 = vmatprep.subr.mxu1 %v319_v17  ;;  %v263_v56 = vadd.f32 %v227_v52, %v226_v53  ;;  %v229_v58 = vld [vmem:[%s1296_s4 + $0x68] sm:$0xff]  ;;  %v228_v59 = vld [vmem:[%s1296_s4 + $0x60] sm:$0xff]  ;;  %v231_v60 = vld [vmem:[%s1296_s4 + $0x78] sm:$0xff]  ;;  %v278_v6 = vadd.f32 %v237_v49, %v236_v55 }
  0x5c   : > { %868 = vmatpush3.msra.mxu0 %v303_v18  ;;  %955 = vmatpush3.msra.mxu1 %v303_v18  ;;  %v230_v61 = vld [vmem:[%s1296_s4 + $0x70] sm:$0xff]  ;;  %v266_v62 = vadd.f32 %v229_v58, %v228_v59  ;;  %v241_v1 = vld [vmem:[%s1296_s4 + $0xc8] sm:$0xff]  ;;  %v240_v3 = vld [vmem:[%s1296_s4 + $0xc0] sm:$0xff] }
  0x5d   : > { %869 = vmatprep.subr.mxu0 %v318_v19  ;;  %940 = vmatprep.subr.mxu1 %v318_v19  ;;  %v238_v63 = vld [vmem:[%s1296_s4 + $0xb0] sm:$0xff]  ;;  %v269_v0 = vadd.f32 %v231_v60, %v230_v61  ;;  %v243_v5 = vld [vmem:[%s1296_s4 + $0xd8] sm:$0xff]  ;;  %v245_v9 = vld [vmem:[%s1296_s4 + $0xe8] sm:$0xff]  ;;  %v284_v10 = vadd.f32 %v241_v1, %v240_v3 }
  0x5e   : > { %870 = vmatpush3.msra.mxu0 %v302_v20  ;;  %956 = vmatpush3.msra.mxu1 %v302_v20  ;;  %v242_v7 = vld [vmem:[%s1296_s4 + $0xd0] sm:$0xff]  ;;  %v281_v8 = vadd.f32 %v239_v57, %v238_v63  ;;  %v244_v11 = vld [vmem:[%s1296_s4 + $0xe0] sm:$0xff]  ;;  %v247_v13 = vld [vmem:[%s1296_s4 + $0xf8] sm:$0xff] }
  0x5f   : > { %871 = vmatprep.subr.mxu0 %v317_v21  ;;  %941 = vmatprep.subr.mxu1 %v317_v21  ;;  %v287_v12 = vadd.f32 %v243_v5, %v242_v7  ;;  %v246_v14 = vld [vmem:[%s1296_s4 + $0xf0] sm:$0xff]  ;;  %v290_v15 = vadd.f32 %v245_v9, %v244_v11  ;;  %v474_v17 = vld [vmem:[%s1356_s17] sm:$0xff]  ;;  %v1360_v18 = vld [vmem:[%s1356_s17 + $0x8] sm:$0xff] }
  0x60   : > { %872 = vmatpush3.msra.mxu0 %v301_v22  ;;  %957 = vmatpush3.msra.mxu1 %v301_v22  ;;  %v293_v16 = vadd.f32 %v247_v13, %v246_v14  ;;  %v490_v19 = vmul.f32 %v474_v17, %v474_v17  ;;  %v491_v20 = vmul.f32 %v1360_v18, %v1360_v18  ;;  %v1365_v21 = vld [vmem:[%s1356_s17 + $0x10] sm:$0xff]  ;;  %v1368_v22 = vld [vmem:[%s1356_s17 + $0x18] sm:$0xff] }
  0x61   : > { %873 = vmatprep.subr.mxu0 %v316_v23  ;;  %942 = vmatprep.subr.mxu1 %v316_v23  ;;  %v492_v23 = vmul.f32 %v1365_v21, %v1365_v21 }
  0x62   : > { %874 = vmatpush3.msra.mxu0 %v300_v24  ;;  %958 = vmatpush3.msra.mxu1 %v300_v24  ;;  %v493_v24 = vmul.f32 %v1368_v22, %v1368_v22 }
  0x63   : > { %875 = vmatprep.subr.mxu0 %v315_v25  ;;  %943 = vmatprep.subr.mxu1 %v315_v25  ;;  %v1375_v25 = vld [vmem:[%s1356_s17 + $0x20] sm:$0xff] }
  0x64   : > { %876 = vmatpush3.msra.mxu0 %v299_v26  ;;  %959 = vmatpush3.msra.mxu1 %v299_v26  ;;  %v1378_v26 = vld [vmem:[%s1356_s17 + $0x28] sm:$0xff] }
  0x65   : > { %877 = vmatprep.subr.mxu0 %v314_v27  ;;  %944 = vmatprep.subr.mxu1 %v314_v27  ;;  %v494_v27 = vmul.f32 %v1375_v25, %v1375_v25 }
  0x66   : > { %878 = vmatpush3.msra.mxu0 %v298_v28  ;;  %960 = vmatpush3.msra.mxu1 %v298_v28  ;;  %v495_v28 = vmul.f32 %v1378_v26, %v1378_v26 }
  0x67   : > { %879 = vmatprep.subr.mxu0 %v313_v29  ;;  %945 = vmatprep.subr.mxu1 %v313_v29  ;;  %v1385_v29 = vld [vmem:[%s1356_s17 + $0x30] sm:$0xff] }
  0x68   : > { %880 = vmatpush3.msra.mxu0 %v297_v30  ;;  %961 = vmatpush3.msra.mxu1 %v297_v30  ;;  %v1388_v30 = vld [vmem:[%s1356_s17 + $0x38] sm:$0xff] }
  0x69   : > { %881 = vmatprep.subr.mxu0 %v312_v31  ;;  %392 = vmatprep.mubr.f32.mxu0 %v217_v32  ;;  %v497_v32 = vmul.f32 %v1388_v30, %v1388_v30 }
  0x6a   : > { %882 = vmatpush3.msra.mxu0 %v296_v33  ;;  %946 = vmatprep.subr.mxu1 %v312_v31  ;;  %v496_v31 = vmul.f32 %v1385_v29, %v1385_v29 }
  0x6b   : > { %393 = vmatmul.mubr.f32.vlgmr.msra.gmra.mxu0 %v216_v34  ;;  %962 = vmatpush3.msra.mxu1 %v296_v33  ;;  %v482_v33 = vld [vmem:[%s1356_s17 + $0x40] sm:$0xff]  ;;  %v483_v34 = vld [vmem:[%s1356_s17 + $0x48] sm:$0xff] }
  0x6c   : > { %432 = vmatprep.mubr.f32.mxu1 %v233_v35  ;;  %397 = vmatprep.mubr.f32.mxu0 %v219_v36  ;;  %v498_v35 = vmul.f32 %v482_v33, %v482_v33  ;;  %v499_v36 = vmul.f32 %v483_v34, %v483_v34 }
  0x6d   : > { %433 = vmatmul.mubr.f32.vlgmr.msra.gmra.mxu1 %v232_v40  ;;  %249 = vadd.xlane.f32.xlu0 %v248_v39 }
  0x6e   : > { %437 = vmatprep.mubr.f32.mxu1 %v235_v42  ;;  %255 = vadd.xlane.f32.xlu1 %v254_v41  ;;  %v1403_v41 = vld [vmem:[%s1356_s17 + $0x60] sm:$0xff]  ;;  %v1406_v42 = vld [vmem:[%s1356_s17 + $0x68] sm:$0xff] }
  0x6f   : > { %398 = vmatmul.mubr.f32.gmra.mxu0 %v218_v43  ;;  %v502_v43 = vmul.f32 %v1403_v41, %v1403_v41 }
  0x70   : > { %402 = vmatprep.mubr.f32.mxu0 %v221_v37  ;;  %v484_v37 = vld [vmem:[%s1356_s17 + $0x50] sm:$0xff] }
  0x71   : > { %438 = vmatmul.mubr.f32.gmra.mxu1 %v234_v47  ;;  %252 = vadd.xlane.f32.xlu0 %v251_v46  ;;  %v500_v39 = vmul.f32 %v484_v37, %v484_v37  ;;  %v1416_v46 = vld [vmem:[%s1356_s17 + $0x78] sm:$0xff] }
  0x72   : > { %442 = vmatprep.mubr.f32.mxu1 %v237_v49  ;;  %258 = vadd.xlane.f32.xlu1 %v257_v48  ;;  %v505_v48 = vmul.f32 %v1416_v46, %v1416_v46 }
  0x73   : > { %403 = vmatmul.mubr.f32.gmra.mxu0 %v220_v38  ;;  %v1398_v38 = vld [vmem:[%s1356_s17 + $0x58] sm:$0xff] }
  0x74   : > { %407 = vmatprep.mubr.f32.mxu0 %v223_v44  ;;  %v501_v40 = vmul.f32 %v1398_v38, %v1398_v38  ;;  %v503_v44 = vmul.f32 %v1406_v42, %v1406_v42 }
  0x75   : > { %443 = vmatmul.mubr.f32.gmra.mxu1 %v236_v55  ;;  %261 = vadd.xlane.f32.xlu0 %v260_v54 }
  0x76   : > { %447 = vmatprep.mubr.f32.mxu1 %v239_v57  ;;  %264 = vadd.xlane.f32.xlu1 %v263_v56 }
  0x77   : > { %408 = vmatmul.mubr.f32.gmra.mxu0 %v222_v45  ;;  %v1413_v45 = vld [vmem:[%s1356_s17 + $0x70] sm:$0xff] }
  0x78   : > { %412 = vmatprep.mubr.f32.mxu0 %v225_v50  ;;  %v504_v47 = vmul.f32 %v1413_v45, %v1413_v45 }
  0x79   : > { %448 = vmatmul.mubr.f32.gmra.mxu1 %v238_v63  ;;  %267 = vadd.xlane.f32.xlu0 %v266_v62 }
  0x7a   : > { %452 = vmatprep.mubr.f32.mxu1 %v241_v1  ;;  %270 = vadd.xlane.f32.xlu1 %v269_v0 }
  0x7b   : > { %413 = vmatmul.mubr.f32.gmra.mxu0 %v224_v51 }
  0x7c   : > { %417 = vmatprep.mubr.f32.mxu0 %v227_v52 }
  0x7d   : > { %453 = vmatmul.mubr.f32.gmra.mxu1 %v240_v3  ;;  %273 = vadd.xlane.f32.xlu0 %v272_v2 }
  0x7e   : > { %457 = vmatprep.mubr.f32.mxu1 %v243_v5  ;;  %276 = vadd.xlane.f32.xlu1 %v275_v4 }
  0x7f   : > { %418 = vmatmul.mubr.f32.gmra.mxu0 %v226_v53 }
  0x80   : > { %422 = vmatprep.mubr.f32.mxu0 %v229_v58 }
  0x81   : > { %458 = vmatmul.mubr.f32.gmra.mxu1 %v242_v7  ;;  %279 = vadd.xlane.f32.xlu0 %v278_v6 }
  0x82   : > { %462 = vmatprep.mubr.f32.mxu1 %v245_v9  ;;  %282 = vadd.xlane.f32.xlu1 %v281_v8 }
  0x83   : > { %423 = vmatmul.mubr.f32.gmra.mxu0 %v228_v59 }
  0x84   : > { %427 = vmatprep.mubr.f32.mxu0 %v231_v60 }
  0x85   : > { %463 = vmatmul.mubr.f32.gmra.mxu1 %v244_v11  ;;  %285 = vadd.xlane.f32.xlu0 %v284_v10 }
  0x86   : > { %467 = vmatprep.mubr.f32.mxu1 %v247_v13  ;;  %288 = vadd.xlane.f32.xlu1 %v287_v12 }
  0x87   : > { %428 = vmatmul.mubr.f32.gmra.mxu0 %v230_v61 }
  0x89   : > { %468 = vmatmul.mubr.f32.gmra.mxu1 %v246_v14  ;;  %291 = vadd.xlane.f32.xlu0 %v290_v15 }
  0x8a   : > { %294 = vadd.xlane.f32.xlu1 %v293_v16 }
  0x8d   : > { %506 = vadd.xlane.f32.xlu0 %v490_v19 }
  0x8e   : > { %508 = vadd.xlane.f32.xlu1 %v491_v20 }
  0x91   : > { %510 = vadd.xlane.f32.xlu0 %v492_v23 }
  0x92   : > { %512 = vadd.xlane.f32.xlu1 %v493_v24 }
  0x95   : > { %514 = vadd.xlane.f32.xlu0 %v494_v27 }
  0x96   : > { %516 = vadd.xlane.f32.xlu1 %v495_v28 }
  0x99   : > { %518 = vadd.xlane.f32.xlu0 %v496_v31 }
  0x9a   : > { %520 = vadd.xlane.f32.xlu1 %v497_v32 }
  0x9d   : > { %522 = vadd.xlane.f32.xlu0 %v498_v35 }
  0x9e   : > { %524 = vadd.xlane.f32.xlu1 %v499_v36 }
  0xa1   : > { %526 = vadd.xlane.f32.xlu0 %v500_v39 }
  0xa2   : > { %528 = vadd.xlane.f32.xlu1 %v501_v40 }
  0xa5   : > { %530 = vadd.xlane.f32.xlu0 %v502_v43 }
  0xa6   : > { %532 = vadd.xlane.f32.xlu1 %v503_v44 }
  0xa9   : > { %534 = vadd.xlane.f32.xlu0 %v504_v47 }
  0xaa   : > { %536 = vadd.xlane.f32.xlu1 %v505_v48 }
 0x12b   : > { %v883_v49 = vpop.f32.mrf.mxu0 }
 0x12d   : > { %v884_v50 = vpop.f32.mrf.mxu0  ;;  %v907_v51 = vpop.f32.mrf.mxu1 }
 0x12e   : > { %v885_v52 = vadd.f32 %v884_v50, %v883_v49 }
 0x12f   : > { %v886_v53 = vpop.f32.mrf.mxu0  ;;  %v908_v54 = vpop.f32.mrf.mxu1 }
 0x130   : > { %v909_v55 = vadd.f32 %v908_v54, %v907_v51  ;;  %v538_v56 = vmul.f32 %v885_v52, %v474_v17  ;;  %v250_v54 = vpop.xlane.xlu0 %249 }
 0x131   : > { %v887_v57 = vpop.f32.mrf.mxu0  ;;  %v910_v58 = vpop.f32.mrf.mxu1 }
 0x132   : > { %v888_v59 = vadd.f32 %v887_v57, %v886_v53  ;;  %554 = vadd.xlane.f32.xlu0 %v538_v56  ;;  %v546_v0 = vmul.f32 %v909_v55, %v482_v33 }
 0x133   : > { %v889_v60 = vpop.f32.mrf.mxu0  ;;  %v911_v61 = vpop.f32.mrf.mxu1 }
 0x134   : > { %v912_v62 = vadd.f32 %v911_v61, %v910_v58  ;;  %v539_v63 = vmul.f32 %v888_v59, %v1360_v18  ;;  %v253_v55 = vpop.xlane.xlu0 %252 }
 0x135   : > { %v890_v1 = vpop.f32.mrf.mxu0  ;;  %v913_v2 = vpop.f32.mrf.mxu1 }
 0x136   : > { %v891_v3 = vadd.f32 %v890_v1, %v889_v60  ;;  %556 = vadd.xlane.f32.xlu1 %v539_v63  ;;  %570 = vadd.xlane.f32.xlu0 %v546_v0  ;;  %v547_v7 = vmul.f32 %v912_v62, %v483_v34 }
 0x137   : > { %v892_v4 = vpop.f32.mrf.mxu0  ;;  %v914_v5 = vpop.f32.mrf.mxu1 }
 0x138   : > { %v915_v6 = vadd.f32 %v914_v5, %v913_v2  ;;  %v540_v8 = vmul.f32 %v891_v3, %v1365_v21  ;;  %v1434_v56 = vpop.xlane.xlu0 %261 }
 0x139   : > { %v893_v9 = vpop.f32.mrf.mxu0  ;;  %v916_v10 = vpop.f32.mrf.mxu1 }
 0x13a   : > { %v894_v11 = vadd.f32 %v893_v9, %v892_v4  ;;  %572 = vadd.xlane.f32.xlu1 %v547_v7  ;;  %558 = vadd.xlane.f32.xlu0 %v540_v8  ;;  %v548_v16 = vmul.f32 %v915_v6, %v484_v37 }
 0x13b   : > { %v895_v12 = vpop.f32.mrf.mxu0  ;;  %v917_v13 = vpop.f32.mrf.mxu1 }
 0x13c   : > { %v918_v14 = vadd.f32 %v917_v13, %v916_v10  ;;  %v541_v15 = vmul.f32 %v894_v11, %v1368_v22  ;;  %v1438_v58 = vpop.xlane.xlu0 %267 }
 0x13d   : > { %v896_v17 = vpop.f32.mrf.mxu0  ;;  %v919_v18 = vpop.f32.mrf.mxu1 }
 0x13e   : > { %v897_v19 = vadd.f32 %v896_v17, %v895_v12  ;;  %560 = vadd.xlane.f32.xlu1 %v541_v15  ;;  %574 = vadd.xlane.f32.xlu0 %v548_v16  ;;  %v549_v21 = vmul.f32 %v918_v14, %v1398_v38 }
 0x13f   : > { %v898_v20 = vpop.f32.mrf.mxu0  ;;  %v920_v23 = vpop.f32.mrf.mxu1 }
 0x140   : > { %v921_v24 = vadd.f32 %v920_v23, %v919_v18  ;;  %v542_v27 = vmul.f32 %v897_v19, %v1375_v25 }
 0x141   : > { %v899_v28 = vpop.f32.mrf.mxu0  ;;  %v922_v31 = vpop.f32.mrf.mxu1 }
 0x142   : > { %v900_v32 = vadd.f32 %v899_v28, %v898_v20  ;;  %576 = vadd.xlane.f32.xlu1 %v549_v21  ;;  %562 = vadd.xlane.f32.xlu0 %v542_v27  ;;  %v550_v36 = vmul.f32 %v921_v24, %v1403_v41  ;;  %v634_v20 = vld [vmem:[#allocation2] sm:$0xff] }
 0x143   : > { %v901_v33 = vpop.f32.mrf.mxu0  ;;  %v923_v22 = vpop.f32.mrf.mxu1 }
 0x144   : > { %v924_v34 = vadd.f32 %v923_v22, %v922_v31  ;;  %v543_v35 = vmul.f32 %v900_v32, %v1378_v26  ;;  %v635_v22 = vld [vmem:[#allocation2 + $0x8] sm:$0xff] }
 0x145   : > { %v902_v37 = vpop.f32.mrf.mxu0  ;;  %v925_v39 = vpop.f32.mrf.mxu1 }
 0x146   : > { %v903_v40 = vadd.f32 %v902_v37, %v901_v33  ;;  %564 = vadd.xlane.f32.xlu1 %v543_v35  ;;  %578 = vadd.xlane.f32.xlu0 %v550_v36  ;;  %v551_v44 = vmul.f32 %v924_v34, %v1406_v42  ;;  %v256_v42 = vpop.xlane.xlu1 %255  ;;  %v642_v34 = vld [vmem:[#allocation2 + $0x40] sm:$0xff] }
 0x147   : > { %v904_v38 = vpop.f32.mrf.mxu0  ;;  %v926_v43 = vpop.f32.mrf.mxu1 }
 0x148   : > { %v927_v25 = vadd.f32 %v926_v43, %v925_v39  ;;  %v544_v47 = vmul.f32 %v903_v40, %v1385_v29 }
 0x149   : > { %v905_v48 = vpop.f32.mrf.mxu0  ;;  %v928_v49 = vpop.f32.mrf.mxu1 }
 0x14a   : > { %v906_v50 = vadd.f32 %v905_v48, %v904_v38  ;;  %580 = vadd.xlane.f32.xlu1 %v551_v44  ;;  %566 = vadd.xlane.f32.xlu0 %v544_v47  ;;  %v552_v52 = vmul.f32 %v927_v25, %v1413_v45  ;;  %v259_v29 = vpop.xlane.xlu1 %258  ;;  %v643_v48 = vld [vmem:[#allocation2 + $0x48] sm:$0xff] }
 0x14b   : > { %v929_v26 = vpop.f32.mrf.mxu1 }
 0x14c   : > { %v930_v51 = vadd.f32 %v929_v26, %v928_v49  ;;  %v545_v41 = vmul.f32 %v906_v50, %v1388_v30  ;;  %v274_v30 = vpop.xlane.xlu0 %273  ;;  %v636_v49 = vld [vmem:[#allocation2 + $0x10] sm:$0xff] }
 0x14e   : > { %568 = vadd.xlane.f32.xlu1 %v545_v41  ;;  %582 = vadd.xlane.f32.xlu0 %v552_v52  ;;  %v553_v53 = vmul.f32 %v930_v51, %v1416_v46  ;;  %v1436_v57 = vpop.xlane.xlu1 %264 }
 0x150   : > { %v280_v45 = vpop.xlane.xlu0 %279 }
 0x152   : > { %584 = vadd.xlane.f32.xlu1 %v553_v53  ;;  %v1440_v59 = vpop.xlane.xlu1 %270 }
 0x154   : > { %v1444_v62 = vpop.xlane.xlu0 %285 }
 0x156   : > { %v277_v60 = vpop.xlane.xlu1 %276 }
 0x158   : > { %v1448_v63 = vpop.xlane.xlu0 %291 }
 0x15a   : > { %v1442_v61 = vpop.xlane.xlu1 %282 }
 0x15c   : > { %v507_v1 = vpop.xlane.xlu0 %506 }
 0x15d   : > { %v586_v16 = vmul.f32 %v507_v1, %v250_v54  ;;  %v644_v1 = vld [vmem:[#allocation2 + $0x50] sm:$0xff] }
 0x15e   : > { %v1446_v46 = vpop.xlane.xlu1 %288 }
 0x160   : > { %v511_v3 = vpop.xlane.xlu0 %510 }
 0x161   : > { %v588_v35 = vmul.f32 %v511_v3, %v256_v42 }
 0x162   : > { %v1450_v0 = vpop.xlane.xlu1 %294 }
 0x164   : > { %v515_v5 = vpop.xlane.xlu0 %514 }
 0x166   : > { %v509_v2 = vpop.xlane.xlu1 %508 }
 0x167   : > { %v587_v23 = vmul.f32 %v509_v2, %v253_v55  ;;  %v590_v2 = vmul.f32 %v515_v5, %v1434_v56 }
 0x168   : > { %v1454_v7 = vpop.xlane.xlu0 %518 }
 0x16a   : > { %v513_v4 = vpop.xlane.xlu1 %512 }
 0x16b   : > { %v589_v50 = vmul.f32 %v513_v4, %v259_v29 }
 0x16c   : > { %v523_v9 = vpop.xlane.xlu0 %522 }
 0x16d   : > { %v594_v24 = vmul.f32 %v523_v9, %v274_v30 }
 0x16e   : > { %v1452_v6 = vpop.xlane.xlu1 %516 }
 0x170   : > { %v527_v11 = vpop.xlane.xlu0 %526 }
 0x171   : > { %v596_v26 = vmul.f32 %v527_v11, %v280_v45 }
 0x172   : > { %v1456_v8 = vpop.xlane.xlu1 %520 }
 0x174   : > { %v531_v13 = vpop.xlane.xlu0 %530 }
 0x175   : > { %v598_v56 = vmul.f32 %v531_v13, %v1444_v62 }
 0x176   : > { %v525_v10 = vpop.xlane.xlu1 %524 }
 0x177   : > { %v595_v36 = vmul.f32 %v525_v10, %v277_v60  ;;  %v637_v60 = vld [vmem:[#allocation2 + $0x18] sm:$0xff] }
 0x178   : > { %v1460_v15 = vpop.xlane.xlu0 %534 }
 0x17a   : > { %v529_v12 = vpop.xlane.xlu1 %528 }
 0x17b   : > { %v597_v3 = vmul.f32 %v529_v12, %v1442_v61 }
 0x17e   : > { %v1458_v14 = vpop.xlane.xlu1 %532 }
 0x182   : > { %v1462_v17 = vpop.xlane.xlu1 %536 }
 0x1bb   : > { %v555_v18 = vpop.xlane.xlu0 %554 }
 0x1bc   : > { %v602_v19 = vsub.f32 %v586_v16, %v555_v18 }
 0x1be   : > { %v618_v21 = vmul.f32 3.0517579e-06, %v602_v19  ;;  %v645_v19 = vld [vmem:[#allocation2 + $0x58] sm:$0xff] }
 0x1bf   : > { %v557_v27 = vpop.xlane.xlu1 %556  ;;  %v571_v28 = vpop.xlane.xlu0 %570 }
 0x1c0   : > { %v650_v31 = vadd.f32 %v634_v20, %v618_v21  ;;  %v603_v32 = vsub.f32 %v587_v23, %v557_v27  ;;  %v610_v33 = vsub.f32 %v594_v24, %v571_v28  ;;  %v638_v20 = vld [vmem:[#allocation2 + $0x20] sm:$0xff]  ;;  %v591_v23 = vmul.f32 %v1452_v6, %v1436_v57 }
 0x1c1   : > { %v599_v57 = vmul.f32 %v1458_v14, %v1446_v46  ;;  %v600_v46 = vmul.f32 %v1460_v15, %v1448_v63 }
 0x1c2   : > { %667 = vst.msk [vmem:[#allocation2] sm:$0xff] %vm666_vm1, %v650_v31  ;;  %v619_v37 = vmul.f32 3.0517579e-06, %v603_v32  ;;  %v626_v39 = vmul.f32 3.0517579e-06, %v610_v33  ;;  %v639_v32 = vld [vmem:[#allocation2 + $0x28] sm:$0xff] }
 0x1c3   : > { %v573_v40 = vpop.xlane.xlu1 %572  ;;  %v559_v38 = vpop.xlane.xlu0 %558  ;;  %v646_v33 = vld [vmem:[#allocation2 + $0x60] sm:$0xff] }
 0x1c4   : > { %v651_v43 = vadd.f32 %v635_v22, %v619_v37  ;;  %v658_v25 = vadd.f32 %v642_v34, %v626_v39  ;;  %v611_v44 = vsub.f32 %v595_v36, %v573_v40  ;;  %v604_v47 = vsub.f32 %v588_v35, %v559_v38  ;;  %v647_v40 = vld [vmem:[#allocation2 + $0x68] sm:$0xff]  ;;  %v640_v38 = vld [vmem:[#allocation2 + $0x30] sm:$0xff] }
 0x1c5   : > { %v592_v22 = vmul.f32 %v1454_v7, %v1438_v58  ;;  %v593_v58 = vmul.f32 %v1456_v8, %v1440_v59  ;;  %v601_v59 = vmul.f32 %v1462_v17, %v1450_v0 }
 0x1c6   : > { %668 = vst.msk [vmem:[#allocation2 + $0x8] sm:$0xff] %vm666_vm1, %v651_v43  ;;  %675 = vst.msk [vmem:[#allocation2 + $0x40] sm:$0xff] %vm666_vm1, %v658_v25  ;;  %v627_v51 = vmul.f32 3.0517579e-06, %v611_v44  ;;  %v620_v41 = vmul.f32 3.0517579e-06, %v604_v47 }
 0x1c7   : > { %v561_v52 = vpop.xlane.xlu1 %560  ;;  %v575_v53 = vpop.xlane.xlu0 %574 }
 0x1c8   : > { %v659_v54 = vadd.f32 %v643_v48, %v627_v51  ;;  %v652_v42 = vadd.f32 %v636_v49, %v620_v41  ;;  %v605_v55 = vsub.f32 %v589_v50, %v561_v52  ;;  %v612_v30 = vsub.f32 %v596_v26, %v575_v53  ;;  %v641_v50 = vld [vmem:[#allocation2 + $0x38] sm:$0xff]  ;;  %v648_v26 = vld [vmem:[#allocation2 + $0x70] sm:$0xff] }
 0x1c9   : > { %v649_v53 = vld [vmem:[#allocation2 + $0x78] sm:$0xff] }
 0x1ca   : > { %676 = vst.msk [vmem:[#allocation2 + $0x48] sm:$0xff] %vm666_vm1, %v659_v54  ;;  %669 = vst.msk [vmem:[#allocation2 + $0x10] sm:$0xff] %vm666_vm1, %v652_v42  ;;  %v621_v29 = vmul.f32 3.0517579e-06, %v605_v55  ;;  %v628_v45 = vmul.f32 3.0517579e-06, %v612_v30 }
 0x1cb   : > { %v577_v4 = vpop.xlane.xlu1 %576  ;;  %v563_v9 = vpop.xlane.xlu0 %562 }
 0x1cc   : > { %v653_v10 = vadd.f32 %v637_v60, %v621_v29  ;;  %v660_v11 = vadd.f32 %v644_v1, %v628_v45  ;;  %v613_v16 = vsub.f32 %v597_v3, %v577_v4  ;;  %v606_v18 = vsub.f32 %v590_v2, %v563_v9 }
 0x1ce   : > { %670 = vst.msk [vmem:[#allocation2 + $0x18] sm:$0xff] %vm666_vm1, %v653_v10  ;;  %677 = vst.msk [vmem:[#allocation2 + $0x50] sm:$0xff] %vm666_vm1, %v660_v11  ;;  %v629_v61 = vmul.f32 3.0517579e-06, %v613_v16  ;;  %v622_v5 = vmul.f32 3.0517579e-06, %v606_v18 }
 0x1cf   : > { %v565_v12 = vpop.xlane.xlu1 %564  ;;  %v579_v24 = vpop.xlane.xlu0 %578 }
 0x1d0   : > { %v661_v21 = vadd.f32 %v645_v19, %v629_v61  ;;  %v654_v27 = vadd.f32 %v638_v20, %v622_v5  ;;  %v607_v28 = vsub.f32 %v591_v23, %v565_v12  ;;  %v614_v31 = vsub.f32 %v598_v56, %v579_v24 }
 0x1d2   : > { %678 = vst.msk [vmem:[#allocation2 + $0x58] sm:$0xff] %vm666_vm1, %v661_v21  ;;  %671 = vst.msk [vmem:[#allocation2 + $0x20] sm:$0xff] %vm666_vm1, %v654_v27  ;;  %v623_v62 = vmul.f32 3.0517579e-06, %v607_v28  ;;  %v630_v6 = vmul.f32 3.0517579e-06, %v614_v31 }
 0x1d3   : > { %v581_v13 = vpop.xlane.xlu1 %580  ;;  %v567_v34 = vpop.xlane.xlu0 %566 }
 0x1d4   : > { %v655_v35 = vadd.f32 %v639_v32, %v623_v62  ;;  %v662_v36 = vadd.f32 %v646_v33, %v630_v6  ;;  %v615_v37 = vsub.f32 %v599_v57, %v581_v13  ;;  %v608_v39 = vsub.f32 %v592_v22, %v567_v34 }
 0x1d6   : > { %672 = vst.msk [vmem:[#allocation2 + $0x28] sm:$0xff] %vm666_vm1, %v655_v35  ;;  %679 = vst.msk [vmem:[#allocation2 + $0x60] sm:$0xff] %vm666_vm1, %v662_v36  ;;  %v631_v7 = vmul.f32 3.0517579e-06, %v615_v37  ;;  %v624_v14 = vmul.f32 3.0517579e-06, %v608_v39 }
 0x1d7   : > { %v569_v43 = vpop.xlane.xlu1 %568  ;;  %v583_v25 = vpop.xlane.xlu0 %582 }
 0x1d8   : > { %v663_v44 = vadd.f32 %v647_v40, %v631_v7  ;;  %v656_v47 = vadd.f32 %v640_v38, %v624_v14  ;;  %v609_v48 = vsub.f32 %v593_v58, %v569_v43  ;;  %v616_v49 = vsub.f32 %v600_v46, %v583_v25 }
 0x1da   : > { %680 = vst.msk [vmem:[#allocation2 + $0x68] sm:$0xff] %vm666_vm1, %v663_v44  ;;  %673 = vst.msk [vmem:[#allocation2 + $0x30] sm:$0xff] %vm666_vm1, %v656_v47  ;;  %v625_v63 = vmul.f32 3.0517579e-06, %v609_v48  ;;  %v632_v8 = vmul.f32 3.0517579e-06, %v616_v49 }
 0x1db   : > { %v585_v15 = vpop.xlane.xlu1 %584 }
 0x1dc   : > { %v657_v51 = vadd.f32 %v641_v50, %v625_v63  ;;  %v664_v41 = vadd.f32 %v648_v26, %v632_v8  ;;  %v617_v52 = vsub.f32 %v601_v59, %v585_v15 }
 0x1de   : > { %674 = vst.msk [vmem:[#allocation2 + $0x38] sm:$0xff] %vm666_vm1, %v657_v51  ;;  %681 = vst.msk [vmem:[#allocation2 + $0x70] sm:$0xff] %vm666_vm1, %v664_v41  ;;  %v633_v54 = vmul.f32 3.0517579e-06, %v617_v52  ;;  %686 = sbr.rel (%p844_p1) target bundleno = 717 (0x2cd), region = 44 }
 0x1e0   : > { %v665_v42 = vadd.f32 %v649_v53, %v633_v54 }
 0x1e2   : > { %682 = vst.msk [vmem:[#allocation2 + $0x78] sm:$0xff] %vm666_vm1, %v665_v42 }
 0x1e3   : > { %v687_v0 = vld [vmem:[#allocation2] sm:$0xff]  ;;  %v688_v17 = vld [vmem:[#allocation2 + $0x8] sm:$0xff]  ;;  %v689_v55 = vld [vmem:[#allocation2 + $0x10] sm:$0xff] }
 0x1e4   : > { %v690_v30 = vld [vmem:[#allocation2 + $0x18] sm:$0xff]  ;;  %v703_v60 = vsel %vm666_vm1, %v687_v0, 0.0  ;;  %v704_v1 = vsel %vm666_vm1, %v688_v17, 0.0  ;;  %v706_v2 = vsel %vm666_vm1, %v689_v55, 0.0  ;;  %v691_v3 = vld [vmem:[#allocation2 + $0x20] sm:$0xff]  ;;  %v692_v4 = vld [vmem:[#allocation2 + $0x28] sm:$0xff] }
 0x1e5   : > { %v705_v29 = vadd.f32 %v704_v1, %v703_v60  ;;  %v708_v45 = vsel %vm666_vm1, %v690_v30, 0.0  ;;  %v710_v10 = vsel %vm666_vm1, %v691_v3, 0.0  ;;  %v693_v11 = vld [vmem:[#allocation2 + $0x30] sm:$0xff]  ;;  %v712_v18 = vsel %vm666_vm1, %v692_v4, 0.0  ;;  %v694_v19 = vld [vmem:[#allocation2 + $0x38] sm:$0xff]  ;;  %v695_v56 = vld [vmem:[#allocation2 + $0x40] sm:$0xff] }
 0x1e6   : > { %v714_v23 = vsel %vm666_vm1, %v693_v11, 0.0  ;;  %v716_v5 = vsel %vm666_vm1, %v694_v19, 0.0  ;;  %v696_v12 = vld [vmem:[#allocation2 + $0x48] sm:$0xff]  ;;  %v718_v21 = vsel %vm666_vm1, %v695_v56, 0.0  ;;  %v697_v27 = vld [vmem:[#allocation2 + $0x50] sm:$0xff]  ;;  %v698_v32 = vld [vmem:[#allocation2 + $0x58] sm:$0xff] }
 0x1e7   : > { %v707_v9 = vadd.f32 %v706_v2, %v705_v29  ;;  %v720_v31 = vsel %vm666_vm1, %v696_v12, 0.0  ;;  %v722_v22 = vsel %vm666_vm1, %v697_v27, 0.0  ;;  %v699_v57 = vld [vmem:[#allocation2 + $0x60] sm:$0xff]  ;;  %v724_v6 = vsel %vm666_vm1, %v698_v32, 0.0  ;;  %v700_v13 = vld [vmem:[#allocation2 + $0x68] sm:$0xff]  ;;  %v701_v36 = vld [vmem:[#allocation2 + $0x70] sm:$0xff] }
 0x1e8   : > { %v726_v35 = vsel %vm666_vm1, %v699_v57, 0.0  ;;  %v728_v39 = vsel %vm666_vm1, %v700_v13, 0.0  ;;  %v730_v58 = vsel %vm666_vm1, %v701_v36, 0.0 }
 0x1e9   : > { %v709_v16 = vadd.f32 %v708_v45, %v707_v9  ;;  %v702_v40 = vld [vmem:[#allocation2 + $0x78] sm:$0xff] }
 0x1ea   : > { %v732_v7 = vsel %vm666_vm1, %v702_v40, 0.0 }
 0x1eb   : > { %v711_v20 = vadd.f32 %v710_v10, %v709_v16 }
 0x1ed   : > { %v713_v61 = vadd.f32 %v712_v18, %v711_v20 }
 0x1ef   : > { %v715_v24 = vadd.f32 %v714_v23, %v713_v61 }
 0x1f1   : > { %v717_v28 = vadd.f32 %v716_v5, %v715_v24 }
 0x1f3   : > { %v719_v33 = vadd.f32 %v718_v21, %v717_v28 }
 0x1f5   : > { %v721_v62 = vadd.f32 %v720_v31, %v719_v33 }
 0x1f7   : > { %v723_v34 = vadd.f32 %v722_v22, %v721_v62 }
 0x1f9   : > { %v725_v37 = vadd.f32 %v724_v6, %v723_v34 }
 0x1fb   : > { %v727_v38 = vadd.f32 %v726_v35, %v725_v37 }
 0x1fd   : > { %v729_v46 = vadd.f32 %v728_v39, %v727_v38 }
 0x1ff   : > { %v731_v14 = vadd.f32 %v730_v58, %v729_v46 }
 0x201   : > { %v733_v43 = vadd.f32 %v732_v7, %v731_v14 }
 0x203   : > { %734 = vadd.xlane.f32.xlu0 %v733_v43 }
 0x28c   : > { %v735_v25 = vpop.xlane.xlu0 %734 }
 0x28d   : > { %v736_v44 = vrot.slane %v735_v25, 4 }
 0x28f   : > { %v737_v47 = vadd.f32 %v736_v44, %v735_v25 }
 0x291   : > { %v738_v48 = vrot.slane %v737_v47, 2 }
 0x293   : > { %v739_v49 = vadd.f32 %v738_v48, %v737_v47 }
 0x295   : > { %v740_v50 = vrot.slane %v739_v49, 1 }
 0x297   : > { %v741_v26 = vadd.f32 %v740_v50, %v739_v49 }
 0x299   : > { %963 = vpush %v741_v26 }
 0x2ca   : > { %s964_s12 = spop %963 }
 0x2cb   : > { %v743_v59 = vstv %s964_s12 }
 0x2cc   : > { %744 = vst [vmem:[#allocation8] sm:$0xff] %v743_v59 }
 0x2cd PF: > { %p1514_p4 = scmp.eq.s32.totalorder %s831_s15, 1  ;;  %s1188_s6 = smov [#allocation8]  }
 0x2ce   : > { %s754_s7 = sshll.u32 %s1188_s6, 4  ;;  %s755_s7 = int_to_ptr.vmem [resolvable:$true] %s754_s7 }
 0x2cf   : > { %s1097_s8 = scalar_lea.vmem %s755_s7, 128  ;;  %p1104_p12 = scmp.lt.s32.totalorder %s755_s7, %s755_s7 }
 0x2d0   : > { %p1098_p10 = scmp.ne.s32.totalorder %s755_s7, %s1097_s8  ;;  %p1105_p13 = scmp.lt.s32.totalorder %s1097_s8, %s1097_s8 }
 0x2d2   : > { %p1099_p11 = pnand %p1098_p10, %p1514_p4  ;;  %p1106_p0 = por %p1105_p13, %p1104_p12 }
 0x2d4   : > { %p1100_p7 = pneg %p1099_p11 }
 0x2d6   : > { %p1107_p2 = pnand %p1106_p0, %p1100_p7 }
 0x2d8   : > { %1110 = shalt.err (!%p1107_p2)
}
 0x2d9   : > { %972 = dma.vmem_to_hbm [thread:$0]  (%p1514_p4), %s755_s7, 128, %s1549_s2, [#allocation5]  }
 0x2da   : > { %1154 = dma.done.wait (%p1514_p4), [#allocation5], 128  }
 0x2db   : > { %1156 = vsyncadd (%p1514_p4), [#allocation5], 4294967168 }
 0x2dc PF: > { %s17_s14 = sadd.s32 1, %s1179_s14   ;;  %s1556_s9 = smov %s1163_s10 }
 0x2dd   : > { %p14_p3 = scmp.ge.s32.totalorder %s17_s14, 4   ;;  %s1557_s10 = smov %s1167_s11 }
 0x2de   : > { %s1558_s11 = smov %s1280_s5  ;;  %s1559_s12 = smov %s1175_s13 }
 0x2df   : > { %s1560_s13 = smov %s1562_s22  ;;  %16 = sbr.rel (!%p14_p3) target bundleno = 6 (0x6), region = 79 }
 0x2e4   :  { %767 = vsyncpa [#allocation4], 1 }
 0x2e5   :  { %769 = vsyncpa [#allocation4 + $0x1], 1 }
 0x2e6   :  { %770 = vsyncpa [#allocation7], 1 }
 0x2e7   :  { %771 = vsyncpa [#allocation5], 1 }
 0x2e8   :  { %773 = vsyncpa [#allocation5 + $0x1], 1 }

// kernel: tpu_custom_call.1
= control target key start
LH: loop header
LB: loop body
LE: loop exit
PB: predicated region body
PF: predicated region fallthrough
CT: control target
= control target key end

     0   :  { %7 = vsyncpa [#allocation4], 0  ;;  %s1547_s0 = inlined_call_operand.hbm [shape: f32[256,256], index: 0, kind: input, shape index: {}]   ;;  %s1548_s1 = inlined_call_operand.hbm [shape: f32[256,128], index: 1, kind: input, shape index: {}]   ;;  %s1549_s2 = inlined_call_operand.hbm [shape: f32[1,8,128], index: 2, kind: output, shape index: {}]  }
   0x1   :  { %9 = vsyncpa [#allocation4 + $0x1], 0 }
   0x2   :  { %10 = vsyncpa [#allocation7], 0 }
   0x3   :  { %11 = vsyncpa [#allocation5], 0  ;;  %s1204_s9 = smov 0   ;;  %s1206_s10 = smov 0  }
   0x4   :  { %s1208_s11 = smov 0   ;;  %s1210_s12 = smov 0  }
   0x5   :  { %s1212_s13 = smov 0   ;;  %s1214_s14 = smov 0  }
   0x6 LB: > { %s831_s15 = sadd.s32 4294967295, %s1179_s14   ;;  %p53_p0 = scmp.ne.s32.totalorder %s1163_s10, %s1159_s9  ;;  %s1179_s14 = sphi %s1214_s14, %s17_s14   ;;  %s1175_s13 = sphi %s1212_s13, %s1560_s13   ;;  %s1171_s12 = sphi %s1210_s12, %s1559_s12   ;;  %s1167_s11 = sphi %s1208_s11, %s1558_s11   ;;  %s1163_s10 = sphi %s1206_s10, %s1557_s10   ;;  %s1159_s9 = sphi %s1204_s9, %s1556_s9  }
   0x7   : > { %p1236_p1 = scmp.eq.s32.totalorder %s831_s15, 0  ;;  %p832_p2 = scmp.ge.s32.totalorder %s1179_s14, 1 }
   0x8   : > { %p111_p3 = scmp.lt.s32.totalorder %s1179_s14, 3  ;;  %s1181_s19 = smov [#allocation6]  }
   0x9   : > { %p1244_p4 = por %p1236_p1, %p53_p0  ;;  %s123_s20 = sshll.u32 %s1181_s19, 4  ;;  %s124_s20 = int_to_ptr.vmem [resolvable:$true] %s123_s20 }
   0xa   : > { %p1248_p5 = pnand %p832_p2, %p111_p3  ;;  %s26_s22 = sadd.s32 1, %s1175_s13 }
   0xb   : > { %s1054_s23 = scalar_lea.vmem %s124_s20, 4096  ;;  %p1062_p12 = scmp.lt.s32.totalorder %s124_s20, %s124_s20 }
   0xc   : > { %p975_p6 = pneg %p1248_p5  ;;  %p1055_p9 = scmp.ne.s32.totalorder %s124_s20, %s1054_s23 }
   0xd   : > { %p1063_p13 = scmp.lt.s32.totalorder %s1054_s23, %s1054_s23 }
   0xe   : > { %p1256_p7 = pnand %p975_p6, %p1236_p1 }
   0xf   : > { %p1064_p0 = por %p1063_p13, %p1062_p12 }
  0x10   : > { %p1045_p8 = pneg %p1256_p7 }
  0x12   : > { %p1057_p10 = pnand %p1055_p9, %p1045_p8 }
  0x14   : > { %p1058_p11 = pneg %p1057_p10 }
  0x16   : > { %p1065_p2 = pnand %p1064_p0, %p1058_p11 }
  0x18   : > { %1068 = shalt.err (!%p1065_p2)
}
  0x19   : > { %s1182_s24 = smov 128   ;;  %s1183_s25 = smov 8  }
  0x1a   : > { %978 = dma.hbm_to_vmem [thread:$0]  (!%p1256_p7), %s1548_s1, 4096, %s124_s20, [#allocation7], %s1182_s24, %s1182_s24, %s1183_s25  }
  0x1b   : > { %p27_p3 = scmp.ge.s32.totalorder %s26_s22, 2  ;;  %s40_s28 = sadd.s32 1, %s1167_s11 }
  0x1c   : > { %p47_p6 = scmp.ne.s32.totalorder %s1167_s11, %s1163_s10  ;;  %p48_p8 = scmp.eq.s32.totalorder %s1179_s14, 0 }
  0x1d   : > { %s1562_s22 = smov (%p27_p3, %s26_s22), 0  ;;  %p984_p10 = scmp.lt.s32.totalorder %s1179_s14, 2 }
  0x1e   : > { %p49_p9 = por %p48_p8, %p47_p6  ;;  %s37_s29 = ssub.s32 %s1175_s13, %s1562_s22 }
  0x1f   : > { %s137_s30 = sand.u32 1, %s1167_s11   ;;  %p38_p11 = scmp.eq.s32.totalorder %s37_s29, 0 }
  0x20   : > { %s835_s3 = sshll.u32 %s137_s30, 8  ;;  %s850_s4 = sshll.u32 %s1175_s13, 12 }
  0x21   : > { %s1280_s5 = scalar_select %p38_p11, %s1167_s11, %s40_s28  }
  0x22   : > { %s150_s8 = scalar_lea.hbm %s1547_s0, %s850_s4  ;;  %s141_s9 = scalar_lea.vmem [#allocation3], %s835_s3 }
  0x23   : > { %s151_s19 = sshll.u32 %s141_s9, 4  ;;  %p1285_p7 = pnand %p984_p10, %p49_p9  ;;  %s152_s19 = int_to_ptr.vmem [resolvable:$true] %s151_s19 }
  0x24   : > { %s138_s21 = scalar_lea.sflag [#allocation4], %s137_s30  ;;  %s1082_s23 = scalar_lea.vmem %s152_s19, 4096 }
  0x25   : > { %p1071_p12 = pneg %p1285_p7  ;;  %p1083_p13 = scmp.ne.s32.totalorder %s152_s19, %s1082_s23 }
  0x26   : > { %s1184_s24 = smov [#allocation3]  }
  0x27   : > { %p1085_p0 = pnand %p1083_p13, %p1071_p12  ;;  %s1087_s25 = sshll.u32 %s1184_s24, 4  ;;  %s1088_s25 = int_to_ptr.vmem [resolvable:$false] %s1087_s25 }
  0x28   : > { %s1089_s26 = scalar_lea.vmem %s1088_s25, 8192  ;;  %p1090_p3 = scmp.lt.s32.totalorder %s152_s19, %s1088_s25 }
  0x29   : > { %p1086_p2 = pneg %p1085_p0  ;;  %p1091_p6 = scmp.lt.s32.totalorder %s1089_s26, %s1082_s23 }
  0x2b   : > { %p1092_p8 = por %p1091_p6, %p1090_p3 }
  0x2d   : > { %p1093_p9 = pnand %p1092_p8, %p1086_p2 }
  0x2f   : > { %1096 = shalt.err (!%p1093_p9)
}
  0x30   : > { %s1185_s27 = smov 256   ;;  %s1186_s28 = smov 16  }
  0x31   : > { %982 = dma.hbm_to_vmem [thread:$0]  (!%p1285_p7), %s150_s8, 4096, %s152_s19, %s138_s21, %s1185_s27, %s1185_s27, %s1186_s28  }
  0x32   : > { %163 = sbr.rel (%p1248_p5) target bundleno = 732 (0x2dc), region = 28  ;;  %s165_s29 = sand.u32 (!%p1248_p5), 1, %s1163_s10  }
  0x33   : > { %s840_s30 = sshll.u32 (!%p1248_p5), %s165_s29, 8  ;;  %s166_s3 = scalar_lea.sflag (!%p1248_p5), [#allocation4], %s165_s29 }
  0x34   : > { %s1296_s4 = scalar_lea.vmem (!%p1248_p5), [#allocation3], %s840_s30 }
  0x37   : > { %1146 = dma.done.wait (%p1244_p4), %s166_s3, 4096  }
  0x38   : > { %1148 = vsyncadd (%p1244_p4), %s166_s3, 4294963200 }
  0x39   : > { %1150 = dma.done.wait (%p1236_p1), [#allocation7], 4096  }
  0x3a   : > { %1152 = vsyncadd (%p1236_p1), [#allocation7], 4294963200  ;;  %p842_p5 = scmp.ne.s32.totalorder %s1171_s12, 0 }
  0x3c   : > { %195 = sbr.rel (%p842_p5) target bundleno = 74 (0x4a), region = 40 }
  0x41   : > { %vm196_vm0 = vcmask 7168   ;;  %v1187_v0 = vmov 0.0  }
  0x42   : > { %197 = vst.msk [vmem:[#allocation2] sm:$0xff] %vm196_vm0, %v1187_v0  ;;  %198 = vst.msk [vmem:[#allocation2 + $0x8] sm:$0xff] %vm196_vm0, %v1187_v0 }
  0x43   : > { %199 = vst.msk [vmem:[#allocation2 + $0x10] sm:$0xff] %vm196_vm0, %v1187_v0  ;;  %200 = vst.msk [vmem:[#allocation2 + $0x18] sm:$0xff] %vm196_vm0, %v1187_v0 }
  0x44   : > { %201 = vst.msk [vmem:[#allocation2 + $0x20] sm:$0xff] %vm196_vm0, %v1187_v0  ;;  %202 = vst.msk [vmem:[#allocation2 + $0x28] sm:$0xff] %vm196_vm0, %v1187_v0 }
  0x45   : > { %203 = vst.msk [vmem:[#allocation2 + $0x30] sm:$0xff] %vm196_vm0, %v1187_v0  ;;  %204 = vst.msk [vmem:[#allocation2 + $0x38] sm:$0xff] %vm196_vm0, %v1187_v0 }
  0x46   : > { %205 = vst.msk [vmem:[#allocation2 + $0x40] sm:$0xff] %vm196_vm0, %v1187_v0  ;;  %206 = vst.msk [vmem:[#allocation2 + $0x48] sm:$0xff] %vm196_vm0, %v1187_v0 }
  0x47   : > { %207 = vst.msk [vmem:[#allocation2 + $0x50] sm:$0xff] %vm196_vm0, %v1187_v0  ;;  %208 = vst.msk [vmem:[#allocation2 + $0x58] sm:$0xff] %vm196_vm0, %v1187_v0 }
  0x48   : > { %209 = vst.msk [vmem:[#allocation2 + $0x60] sm:$0xff] %vm196_vm0, %v1187_v0  ;;  %210 = vst.msk [vmem:[#allocation2 + $0x68] sm:$0xff] %vm196_vm0, %v1187_v0 }
  0x49   : > { %211 = vst.msk [vmem:[#allocation2 + $0x70] sm:$0xff] %vm196_vm0, %v1187_v0  ;;  %212 = vst.msk [vmem:[#allocation2 + $0x78] sm:$0xff] %vm196_vm0, %v1187_v0 }
  0x4a PF: > { %v327_v1 = vld [vmem:[#allocation6 + $0xf8] sm:$0xff]  ;;  %v326_v3 = vld [vmem:[#allocation6 + $0xf0] sm:$0xff]  ;;  %v325_v5 = vld [vmem:[#allocation6 + $0xe8] sm:$0xff]  ;;  %s843_s16 = sshll.u32 %s1171_s12, 7  ;;  %vm666_vm1 = vcmask 7168   ;;  %p844_p1 = scmp.ne.s32.totalorder %s1171_s12, 1 }
  0x4b   : > { %v311_v2 = vld [vmem:[#allocation6 + $0x78] sm:$0xff]  ;;  %851 = vmatprep.subr.mxu0 %v327_v1  ;;  %931 = vmatprep.subr.mxu1 %v327_v1  ;;  %v310_v4 = vld [vmem:[#allocation6 + $0x70] sm:$0xff]  ;;  %v309_v6 = vld [vmem:[#allocation6 + $0x68] sm:$0xff]  ;;  %s1356_s17 = scalar_lea.vmem [#allocation6], %s843_s16 }
  0x4c   : > { %852 = vmatpush3.msra.mxu0 %v311_v2  ;;  %947 = vmatpush3.msra.mxu1 %v311_v2  ;;  %v324_v7 = vld [vmem:[#allocation6 + $0xe0] sm:$0xff]  ;;  %v323_v9 = vld [vmem:[#allocation6 + $0xd8] sm:$0xff]  ;;  %v322_v11 = vld [vmem:[#allocation6 + $0xd0] sm:$0xff] }
  0x4d   : > { %853 = vmatprep.subr.mxu0 %v326_v3  ;;  %932 = vmatprep.subr.mxu1 %v326_v3  ;;  %v308_v8 = vld [vmem:[#allocation6 + $0x60] sm:$0xff]  ;;  %v307_v10 = vld [vmem:[#allocation6 + $0x58] sm:$0xff]  ;;  %v306_v12 = vld [vmem:[#allocation6 + $0x50] sm:$0xff] }
  0x4e   : > { %854 = vmatpush3.msra.mxu0 %v310_v4  ;;  %948 = vmatpush3.msra.mxu1 %v310_v4  ;;  %v321_v13 = vld [vmem:[#allocation6 + $0xc8] sm:$0xff]  ;;  %v320_v15 = vld [vmem:[#allocation6 + $0xc0] sm:$0xff]  ;;  %v319_v17 = vld [vmem:[#allocation6 + $0xb8] sm:$0xff] }
  0x4f   : > { %855 = vmatprep.subr.mxu0 %v325_v5  ;;  %933 = vmatprep.subr.mxu1 %v325_v5  ;;  %v305_v14 = vld [vmem:[#allocation6 + $0x48] sm:$0xff]  ;;  %v304_v16 = vld [vmem:[#allocation6 + $0x40] sm:$0xff]  ;;  %v303_v18 = vld [vmem:[#allocation6 + $0x38] sm:$0xff] }
  0x50   : > { %856 = vmatpush3.msra.mxu0 %v309_v6  ;;  %949 = vmatpush3.msra.mxu1 %v309_v6  ;;  %v318_v19 = vld [vmem:[#allocation6 + $0xb0] sm:$0xff]  ;;  %v317_v21 = vld [vmem:[#allocation6 + $0xa8] sm:$0xff]  ;;  %v316_v23 = vld [vmem:[#allocation6 + $0xa0] sm:$0xff] }
  0x51   : > { %857 = vmatprep.subr.mxu0 %v324_v7  ;;  %934 = vmatprep.subr.mxu1 %v324_v7  ;;  %v302_v20 = vld [vmem:[#allocation6 + $0x30] sm:$0xff]  ;;  %v301_v22 = vld [vmem:[#allocation6 + $0x28] sm:$0xff]  ;;  %v300_v24 = vld [vmem:[#allocation6 + $0x20] sm:$0xff] }
  0x52   : > { %858 = vmatpush3.msra.mxu0 %v308_v8  ;;  %950 = vmatpush3.msra.mxu1 %v308_v8  ;;  %v315_v25 = vld [vmem:[#allocation6 + $0x98] sm:$0xff]  ;;  %v314_v27 = vld [vmem:[#allocation6 + $0x90] sm:$0xff]  ;;  %v313_v29 = vld [vmem:[#allocation6 + $0x88] sm:$0xff] }
  0x53   : > { %859 = vmatprep.subr.mxu0 %v323_v9  ;;  %935 = vmatprep.subr.mxu1 %v323_v9  ;;  %v299_v26 = vld [vmem:[#allocation6 + $0x18] sm:$0xff]  ;;  %v298_v28 = vld [vmem:[#allocation6 + $0x10] sm:$0xff]  ;;  %v297_v30 = vld [vmem:[#allocation6 + $0x8] sm:$0xff] }
  0x54   : > { %860 = vmatpush3.msra.mxu0 %v307_v10  ;;  %951 = vmatpush3.msra.mxu1 %v307_v10  ;;  %v312_v31 = vld [vmem:[#allocation6 + $0x80] sm:$0xff]  ;;  %v217_v32 = vld [vmem:[%s1296_s4 + $0x8] sm:$0xff]  ;;  %v219_v36 = vld [vmem:[%s1296_s4 + $0x18] sm:$0xff] }
  0x55   : > { %861 = vmatprep.subr.mxu0 %v322_v11  ;;  %936 = vmatprep.subr.mxu1 %v322_v11  ;;  %v296_v33 = vld [vmem:[#allocation6] sm:$0xff]  ;;  %v233_v35 = vld [vmem:[%s1296_s4 + $0x88] sm:$0xff]  ;;  %v235_v42 = vld [vmem:[%s1296_s4 + $0x98] sm:$0xff] }
  0x56   : > { %862 = vmatpush3.msra.mxu0 %v306_v12  ;;  %952 = vmatpush3.msra.mxu1 %v306_v12  ;;  %v216_v34 = vld [vmem:[%s1296_s4] sm:$0xff]  ;;  %v221_v37 = vld [vmem:[%s1296_s4 + $0x28] sm:$0xff]  ;;  %v218_v43 = vld [vmem:[%s1296_s4 + $0x10] sm:$0xff] }
  0x57   : > { %863 = vmatprep.subr.mxu0 %v321_v13  ;;  %937 = vmatprep.subr.mxu1 %v321_v13  ;;  %v220_v38 = vld [vmem:[%s1296_s4 + $0x20] sm:$0xff]  ;;  %v248_v39 = vadd.f32 %v217_v32, %v216_v34  ;;  %v223_v44 = vld [vmem:[%s1296_s4 + $0x38] sm:$0xff]  ;;  %v222_v45 = vld [vmem:[%s1296_s4 + $0x30] sm:$0xff]  ;;  %v251_v46 = vadd.f32 %v219_v36, %v218_v43 }
  0x58   : > { %864 = vmatpush3.msra.mxu0 %v305_v14  ;;  %953 = vmatpush3.msra.mxu1 %v305_v14  ;;  %v232_v40 = vld [vmem:[%s1296_s4 + $0x80] sm:$0xff]  ;;  %v254_v41 = vadd.f32 %v221_v37, %v220_v38  ;;  %v234_v47 = vld [vmem:[%s1296_s4 + $0x90] sm:$0xff]  ;;  %v257_v48 = vadd.f32 %v223_v44, %v222_v45  ;;  %v237_v49 = vld [vmem:[%s1296_s4 + $0xa8] sm:$0xff] }
  0x59   : > { %865 = vmatprep.subr.mxu0 %v320_v15  ;;  %938 = vmatprep.subr.mxu1 %v320_v15  ;;  %v225_v50 = vld [vmem:[%s1296_s4 + $0x48] sm:$0xff]  ;;  %v224_v51 = vld [vmem:[%s1296_s4 + $0x40] sm:$0xff]  ;;  %v227_v52 = vld [vmem:[%s1296_s4 + $0x58] sm:$0xff]  ;;  %v272_v2 = vadd.f32 %v233_v35, %v232_v40  ;;  %v275_v4 = vadd.f32 %v235_v42, %v234_v47 }
  0x5a   : > { %866 = vmatpush3.msra.mxu0 %v304_v16  ;;  %954 = vmatpush3.msra.mxu1 %v304_v16  ;;  %v226_v53 = vld [vmem:[%s1296_s4 + $0x50] sm:$0xff]  ;;  %v260_v54 = vadd.f32 %v225_v50, %v224_v51  ;;  %v236_v55 = vld [vmem:[%s1296_s4 + $0xa0] sm:$0xff]  ;;  %v239_v57 = vld [vmem:[%s1296_s4 + $0xb8] sm:$0xff] }
  0x5b   : > { %867 = vmatprep.subr.mxu0 %v319_v17  ;;  %939 = vmatprep.subr.mxu1 %v319_v17  ;;  %v263_v56 = vadd.f32 %v227_v52, %v226_v53  ;;  %v229_v58 = vld [vmem:[%s1296_s4 + $0x68] sm:$0xff]  ;;  %v228_v59 = vld [vmem:[%s1296_s4 + $0x60] sm:$0xff]  ;;  %v231_v60 = vld [vmem:[%s1296_s4 + $0x78] sm:$0xff]  ;;  %v278_v6 = vadd.f32 %v237_v49, %v236_v55 }
  0x5c   : > { %868 = vmatpush3.msra.mxu0 %v303_v18  ;;  %955 = vmatpush3.msra.mxu1 %v303_v18  ;;  %v230_v61 = vld [vmem:[%s1296_s4 + $0x70] sm:$0xff]  ;;  %v266_v62 = vadd.f32 %v229_v58, %v228_v59  ;;  %v241_v1 = vld [vmem:[%s1296_s4 + $0xc8] sm:$0xff]  ;;  %v240_v3 = vld [vmem:[%s1296_s4 + $0xc0] sm:$0xff] }
  0x5d   : > { %869 = vmatprep.subr.mxu0 %v318_v19  ;;  %940 = vmatprep.subr.mxu1 %v318_v19  ;;  %v238_v63 = vld [vmem:[%s1296_s4 + $0xb0] sm:$0xff]  ;;  %v269_v0 = vadd.f32 %v231_v60, %v230_v61  ;;  %v243_v5 = vld [vmem:[%s1296_s4 + $0xd8] sm:$0xff]  ;;  %v245_v9 = vld [vmem:[%s1296_s4 + $0xe8] sm:$0xff]  ;;  %v284_v10 = vadd.f32 %v241_v1, %v240_v3 }
  0x5e   : > { %870 = vmatpush3.msra.mxu0 %v302_v20  ;;  %956 = vmatpush3.msra.mxu1 %v302_v20  ;;  %v242_v7 = vld [vmem:[%s1296_s4 + $0xd0] sm:$0xff]  ;;  %v281_v8 = vadd.f32 %v239_v57, %v238_v63  ;;  %v244_v11 = vld [vmem:[%s1296_s4 + $0xe0] sm:$0xff]  ;;  %v247_v13 = vld [vmem:[%s1296_s4 + $0xf8] sm:$0xff] }
  0x5f   : > { %871 = vmatprep.subr.mxu0 %v317_v21  ;;  %941 = vmatprep.subr.mxu1 %v317_v21  ;;  %v287_v12 = vadd.f32 %v243_v5, %v242_v7  ;;  %v246_v14 = vld [vmem:[%s1296_s4 + $0xf0] sm:$0xff]  ;;  %v290_v15 = vadd.f32 %v245_v9, %v244_v11  ;;  %v474_v17 = vld [vmem:[%s1356_s17] sm:$0xff]  ;;  %v1360_v18 = vld [vmem:[%s1356_s17 + $0x8] sm:$0xff] }
  0x60   : > { %872 = vmatpush3.msra.mxu0 %v301_v22  ;;  %957 = vmatpush3.msra.mxu1 %v301_v22  ;;  %v293_v16 = vadd.f32 %v247_v13, %v246_v14  ;;  %v490_v19 = vmul.f32 %v474_v17, %v474_v17  ;;  %v491_v20 = vmul.f32 %v1360_v18, %v1360_v18  ;;  %v1365_v21 = vld [vmem:[%s1356_s17 + $0x10] sm:$0xff]  ;;  %v1368_v22 = vld [vmem:[%s1356_s17 + $0x18] sm:$0xff] }
  0x61   : > { %873 = vmatprep.subr.mxu0 %v316_v23  ;;  %942 = vmatprep.subr.mxu1 %v316_v23  ;;  %v492_v23 = vmul.f32 %v1365_v21, %v1365_v21 }
  0x62   : > { %874 = vmatpush3.msra.mxu0 %v300_v24  ;;  %958 = vmatpush3.msra.mxu1 %v300_v24  ;;  %v493_v24 = vmul.f32 %v1368_v22, %v1368_v22 }
  0x63   : > { %875 = vmatprep.subr.mxu0 %v315_v25  ;;  %943 = vmatprep.subr.mxu1 %v315_v25  ;;  %v1375_v25 = vld [vmem:[%s1356_s17 + $0x20] sm:$0xff] }
  0x64   : > { %876 = vmatpush3.msra.mxu0 %v299_v26  ;;  %959 = vmatpush3.msra.mxu1 %v299_v26  ;;  %v1378_v26 = vld [vmem:[%s1356_s17 + $0x28] sm:$0xff] }
  0x65   : > { %877 = vmatprep.subr.mxu0 %v314_v27  ;;  %944 = vmatprep.subr.mxu1 %v314_v27  ;;  %v494_v27 = vmul.f32 %v1375_v25, %v1375_v25 }
  0x66   : > { %878 = vmatpush3.msra.mxu0 %v298_v28  ;;  %960 = vmatpush3.msra.mxu1 %v298_v28  ;;  %v495_v28 = vmul.f32 %v1378_v26, %v1378_v26 }
  0x67   : > { %879 = vmatprep.subr.mxu0 %v313_v29  ;;  %945 = vmatprep.subr.mxu1 %v313_v29  ;;  %v1385_v29 = vld [vmem:[%s1356_s17 + $0x30] sm:$0xff] }
  0x68   : > { %880 = vmatpush3.msra.mxu0 %v297_v30  ;;  %961 = vmatpush3.msra.mxu1 %v297_v30  ;;  %v1388_v30 = vld [vmem:[%s1356_s17 + $0x38] sm:$0xff] }
  0x69   : > { %881 = vmatprep.subr.mxu0 %v312_v31  ;;  %392 = vmatprep.mubr.f32.mxu0 %v217_v32  ;;  %v497_v32 = vmul.f32 %v1388_v30, %v1388_v30 }
  0x6a   : > { %882 = vmatpush3.msra.mxu0 %v296_v33  ;;  %946 = vmatprep.subr.mxu1 %v312_v31  ;;  %v496_v31 = vmul.f32 %v1385_v29, %v1385_v29 }
  0x6b   : > { %393 = vmatmul.mubr.f32.vlgmr.msra.gmra.mxu0 %v216_v34  ;;  %962 = vmatpush3.msra.mxu1 %v296_v33  ;;  %v482_v33 = vld [vmem:[%s1356_s17 + $0x40] sm:$0xff]  ;;  %v483_v34 = vld [vmem:[%s1356_s17 + $0x48] sm:$0xff] }
  0x6c   : > { %432 = vmatprep.mubr.f32.mxu1 %v233_v35  ;;  %397 = vmatprep.mubr.f32.mxu0 %v219_v36  ;;  %v498_v35 = vmul.f32 %v482_v33, %v482_v33  ;;  %v499_v36 = vmul.f32 %v483_v34, %v483_v34 }
  0x6d   : > { %433 = vmatmul.mubr.f32.vlgmr.msra.gmra.mxu1 %v232_v40  ;;  %249 = vadd.xlane.f32.xlu0 %v248_v39 }
  0x6e   : > { %437 = vmatprep.mubr.f32.mxu1 %v235_v42  ;;  %255 = vadd.xlane.f32.xlu1 %v254_v41  ;;  %v1403_v41 = vld [vmem:[%s1356_s17 + $0x60] sm:$0xff]  ;;  %v1406_v42 = vld [vmem:[%s1356_s17 + $0x68] sm:$0xff] }
  0x6f   : > { %398 = vmatmul.mubr.f32.gmra.mxu0 %v218_v43  ;;  %v502_v43 = vmul.f32 %v1403_v41, %v1403_v41 }
  0x70   : > { %402 = vmatprep.mubr.f32.mxu0 %v221_v37  ;;  %v484_v37 = vld [vmem:[%s1356_s17 + $0x50] sm:$0xff] }
  0x71   : > { %438 = vmatmul.mubr.f32.gmra.mxu1 %v234_v47  ;;  %252 = vadd.xlane.f32.xlu0 %v251_v46  ;;  %v500_v39 = vmul.f32 %v484_v37, %v484_v37  ;;  %v1416_v46 = vld [vmem:[%s1356_s17 + $0x78] sm:$0xff] }
  0x72   : > { %442 = vmatprep.mubr.f32.mxu1 %v237_v49  ;;  %258 = vadd.xlane.f32.xlu1 %v257_v48  ;;  %v505_v48 = vmul.f32 %v1416_v46, %v1416_v46 }
  0x73   : > { %403 = vmatmul.mubr.f32.gmra.mxu0 %v220_v38  ;;  %v1398_v38 = vld [vmem:[%s1356_s17 + $0x58] sm:$0xff] }
  0x74   : > { %407 = vmatprep.mubr.f32.mxu0 %v223_v44  ;;  %v501_v40 = vmul.f32 %v1398_v38, %v1398_v38  ;;  %v503_v44 = vmul.f32 %v1406_v42, %v1406_v42 }
  0x75   : > { %443 = vmatmul.mubr.f32.gmra.mxu1 %v236_v55  ;;  %261 = vadd.xlane.f32.xlu0 %v260_v54 }
  0x76   : > { %447 = vmatprep.mubr.f32.mxu1 %v239_v57  ;;  %264 = vadd.xlane.f32.xlu1 %v263_v56 }
  0x77   : > { %408 = vmatmul.mubr.f32.gmra.mxu0 %v222_v45  ;;  %v1413_v45 = vld [vmem:[%s1356_s17 + $0x70] sm:$0xff] }
  0x78   : > { %412 = vmatprep.mubr.f32.mxu0 %v225_v50  ;;  %v504_v47 = vmul.f32 %v1413_v45, %v1413_v45 }
  0x79   : > { %448 = vmatmul.mubr.f32.gmra.mxu1 %v238_v63  ;;  %267 = vadd.xlane.f32.xlu0 %v266_v62 }
  0x7a   : > { %452 = vmatprep.mubr.f32.mxu1 %v241_v1  ;;  %270 = vadd.xlane.f32.xlu1 %v269_v0 }
  0x7b   : > { %413 = vmatmul.mubr.f32.gmra.mxu0 %v224_v51 }
  0x7c   : > { %417 = vmatprep.mubr.f32.mxu0 %v227_v52 }
  0x7d   : > { %453 = vmatmul.mubr.f32.gmra.mxu1 %v240_v3  ;;  %273 = vadd.xlane.f32.xlu0 %v272_v2 }
  0x7e   : > { %457 = vmatprep.mubr.f32.mxu1 %v243_v5  ;;  %276 = vadd.xlane.f32.xlu1 %v275_v4 }
  0x7f   : > { %418 = vmatmul.mubr.f32.gmra.mxu0 %v226_v53 }
  0x80   : > { %422 = vmatprep.mubr.f32.mxu0 %v229_v58 }
  0x81   : > { %458 = vmatmul.mubr.f32.gmra.mxu1 %v242_v7  ;;  %279 = vadd.xlane.f32.xlu0 %v278_v6 }
  0x82   : > { %462 = vmatprep.mubr.f32.mxu1 %v245_v9  ;;  %282 = vadd.xlane.f32.xlu1 %v281_v8 }
  0x83   : > { %423 = vmatmul.mubr.f32.gmra.mxu0 %v228_v59 }
  0x84   : > { %427 = vmatprep.mubr.f32.mxu0 %v231_v60 }
  0x85   : > { %463 = vmatmul.mubr.f32.gmra.mxu1 %v244_v11  ;;  %285 = vadd.xlane.f32.xlu0 %v284_v10 }
  0x86   : > { %467 = vmatprep.mubr.f32.mxu1 %v247_v13  ;;  %288 = vadd.xlane.f32.xlu1 %v287_v12 }
  0x87   : > { %428 = vmatmul.mubr.f32.gmra.mxu0 %v230_v61 }
  0x89   : > { %468 = vmatmul.mubr.f32.gmra.mxu1 %v246_v14  ;;  %291 = vadd.xlane.f32.xlu0 %v290_v15 }
  0x8a   : > { %294 = vadd.xlane.f32.xlu1 %v293_v16 }
  0x8d   : > { %506 = vadd.xlane.f32.xlu0 %v490_v19 }
  0x8e   : > { %508 = vadd.xlane.f32.xlu1 %v491_v20 }
  0x91   : > { %510 = vadd.xlane.f32.xlu0 %v492_v23 }
  0x92   : > { %512 = vadd.xlane.f32.xlu1 %v493_v24 }
  0x95   : > { %514 = vadd.xlane.f32.xlu0 %v494_v27 }
  0x96   : > { %516 = vadd.xlane.f32.xlu1 %v495_v28 }
  0x99   : > { %518 = vadd.xlane.f32.xlu0 %v496_v31 }
  0x9a   : > { %520 = vadd.xlane.f32.xlu1 %v497_v32 }
  0x9d   : > { %522 = vadd.xlane.f32.xlu0 %v498_v35 }
  0x9e   : > { %524 = vadd.xlane.f32.xlu1 %v499_v36 }
  0xa1   : > { %526 = vadd.xlane.f32.xlu0 %v500_v39 }
  0xa2   : > { %528 = vadd.xlane.f32.xlu1 %v501_v40 }
  0xa5   : > { %530 = vadd.xlane.f32.xlu0 %v502_v43 }
  0xa6   : > { %532 = vadd.xlane.f32.xlu1 %v503_v44 }
  0xa9   : > { %534 = vadd.xlane.f32.xlu0 %v504_v47 }
  0xaa   : > { %536 = vadd.xlane.f32.xlu1 %v505_v48 }
 0x12b   : > { %v883_v49 = vpop.f32.mrf.mxu0 }
 0x12d   : > { %v884_v50 = vpop.f32.mrf.mxu0  ;;  %v907_v51 = vpop.f32.mrf.mxu1 }
 0x12e   : > { %v885_v52 = vadd.f32 %v884_v50, %v883_v49 }
 0x12f   : > { %v886_v53 = vpop.f32.mrf.mxu0  ;;  %v908_v54 = vpop.f32.mrf.mxu1 }
 0x130   : > { %v909_v55 = vadd.f32 %v908_v54, %v907_v51  ;;  %v538_v56 = vmul.f32 %v885_v52, %v474_v17  ;;  %v250_v54 = vpop.xlane.xlu0 %249 }
 0x131   : > { %v887_v57 = vpop.f32.mrf.mxu0  ;;  %v910_v58 = vpop.f32.mrf.mxu1 }
 0x132   : > { %v888_v59 = vadd.f32 %v887_v57, %v886_v53  ;;  %554 = vadd.xlane.f32.xlu0 %v538_v56  ;;  %v546_v0 = vmul.f32 %v909_v55, %v482_v33 }
 0x133   : > { %v889_v60 = vpop.f32.mrf.mxu0  ;;  %v911_v61 = vpop.f32.mrf.mxu1 }
 0x134   : > { %v912_v62 = vadd.f32 %v911_v61, %v910_v58  ;;  %v539_v63 = vmul.f32 %v888_v59, %v1360_v18  ;;  %v253_v55 = vpop.xlane.xlu0 %252 }
 0x135   : > { %v890_v1 = vpop.f32.mrf.mxu0  ;;  %v913_v2 = vpop.f32.mrf.mxu1 }
 0x136   : > { %v891_v3 = vadd.f32 %v890_v1, %v889_v60  ;;  %556 = vadd.xlane.f32.xlu1 %v539_v63  ;;  %570 = vadd.xlane.f32.xlu0 %v546_v0  ;;  %v547_v7 = vmul.f32 %v912_v62, %v483_v34 }
 0x137   : > { %v892_v4 = vpop.f32.mrf.mxu0  ;;  %v914_v5 = vpop.f32.mrf.mxu1 }
 0x138   : > { %v915_v6 = vadd.f32 %v914_v5, %v913_v2  ;;  %v540_v8 = vmul.f32 %v891_v3, %v1365_v21  ;;  %v1434_v56 = vpop.xlane.xlu0 %261 }
 0x139   : > { %v893_v9 = vpop.f32.mrf.mxu0  ;;  %v916_v10 = vpop.f32.mrf.mxu1 }
 0x13a   : > { %v894_v11 = vadd.f32 %v893_v9, %v892_v4  ;;  %572 = vadd.xlane.f32.xlu1 %v547_v7  ;;  %558 = vadd.xlane.f32.xlu0 %v540_v8  ;;  %v548_v16 = vmul.f32 %v915_v6, %v484_v37 }
 0x13b   : > { %v895_v12 = vpop.f32.mrf.mxu0  ;;  %v917_v13 = vpop.f32.mrf.mxu1 }
 0x13c   : > { %v918_v14 = vadd.f32 %v917_v13, %v916_v10  ;;  %v541_v15 = vmul.f32 %v894_v11, %v1368_v22  ;;  %v1438_v58 = vpop.xlane.xlu0 %267 }
 0x13d   : > { %v896_v17 = vpop.f32.mrf.mxu0  ;;  %v919_v18 = vpop.f32.mrf.mxu1 }
 0x13e   : > { %v897_v19 = vadd.f32 %v896_v17, %v895_v12  ;;  %560 = vadd.xlane.f32.xlu1 %v541_v15  ;;  %574 = vadd.xlane.f32.xlu0 %v548_v16  ;;  %v549_v21 = vmul.f32 %v918_v14, %v1398_v38 }
 0x13f   : > { %v898_v20 = vpop.f32.mrf.mxu0  ;;  %v920_v23 = vpop.f32.mrf.mxu1 }
 0x140   : > { %v921_v24 = vadd.f32 %v920_v23, %v919_v18  ;;  %v542_v27 = vmul.f32 %v897_v19, %v1375_v25 }
 0x141   : > { %v899_v28 = vpop.f32.mrf.mxu0  ;;  %v922_v31 = vpop.f32.mrf.mxu1 }
 0x142   : > { %v900_v32 = vadd.f32 %v899_v28, %v898_v20  ;;  %576 = vadd.xlane.f32.xlu1 %v549_v21  ;;  %562 = vadd.xlane.f32.xlu0 %v542_v27  ;;  %v550_v36 = vmul.f32 %v921_v24, %v1403_v41  ;;  %v634_v20 = vld [vmem:[#allocation2] sm:$0xff] }
 0x143   : > { %v901_v33 = vpop.f32.mrf.mxu0  ;;  %v923_v22 = vpop.f32.mrf.mxu1 }
 0x144   : > { %v924_v34 = vadd.f32 %v923_v22, %v922_v31  ;;  %v543_v35 = vmul.f32 %v900_v32, %v1378_v26  ;;  %v635_v22 = vld [vmem:[#allocation2 + $0x8] sm:$0xff] }
 0x145   : > { %v902_v37 = vpop.f32.mrf.mxu0  ;;  %v925_v39 = vpop.f32.mrf.mxu1 }
 0x146   : > { %v903_v40 = vadd.f32 %v902_v37, %v901_v33  ;;  %564 = vadd.xlane.f32.xlu1 %v543_v35  ;;  %578 = vadd.xlane.f32.xlu0 %v550_v36  ;;  %v551_v44 = vmul.f32 %v924_v34, %v1406_v42  ;;  %v256_v42 = vpop.xlane.xlu1 %255  ;;  %v642_v34 = vld [vmem:[#allocation2 + $0x40] sm:$0xff] }
 0x147   : > { %v904_v38 = vpop.f32.mrf.mxu0  ;;  %v926_v43 = vpop.f32.mrf.mxu1 }
 0x148   : > { %v927_v25 = vadd.f32 %v926_v43, %v925_v39  ;;  %v544_v47 = vmul.f32 %v903_v40, %v1385_v29 }
 0x149   : > { %v905_v48 = vpop.f32.mrf.mxu0  ;;  %v928_v49 = vpop.f32.mrf.mxu1 }
 0x14a   : > { %v906_v50 = vadd.f32 %v905_v48, %v904_v38  ;;  %580 = vadd.xlane.f32.xlu1 %v551_v44  ;;  %566 = vadd.xlane.f32.xlu0 %v544_v47  ;;  %v552_v52 = vmul.f32 %v927_v25, %v1413_v45  ;;  %v259_v29 = vpop.xlane.xlu1 %258  ;;  %v643_v48 = vld [vmem:[#allocation2 + $0x48] sm:$0xff] }
 0x14b   : > { %v929_v26 = vpop.f32.mrf.mxu1 }
 0x14c   : > { %v930_v51 = vadd.f32 %v929_v26, %v928_v49  ;;  %v545_v41 = vmul.f32 %v906_v50, %v1388_v30  ;;  %v274_v30 = vpop.xlane.xlu0 %273  ;;  %v636_v49 = vld [vmem:[#allocation2 + $0x10] sm:$0xff] }
 0x14e   : > { %568 = vadd.xlane.f32.xlu1 %v545_v41  ;;  %582 = vadd.xlane.f32.xlu0 %v552_v52  ;;  %v553_v53 = vmul.f32 %v930_v51, %v1416_v46  ;;  %v1436_v57 = vpop.xlane.xlu1 %264 }
 0x150   : > { %v280_v45 = vpop.xlane.xlu0 %279 }
 0x152   : > { %584 = vadd.xlane.f32.xlu1 %v553_v53  ;;  %v1440_v59 = vpop.xlane.xlu1 %270 }
 0x154   : > { %v1444_v62 = vpop.xlane.xlu0 %285 }
 0x156   : > { %v277_v60 = vpop.xlane.xlu1 %276 }
 0x158   : > { %v1448_v63 = vpop.xlane.xlu0 %291 }
 0x15a   : > { %v1442_v61 = vpop.xlane.xlu1 %282 }
 0x15c   : > { %v507_v1 = vpop.xlane.xlu0 %506 }
 0x15d   : > { %v586_v16 = vmul.f32 %v507_v1, %v250_v54  ;;  %v644_v1 = vld [vmem:[#allocation2 + $0x50] sm:$0xff] }
 0x15e   : > { %v1446_v46 = vpop.xlane.xlu1 %288 }
 0x160   : > { %v511_v3 = vpop.xlane.xlu0 %510 }
 0x161   : > { %v588_v35 = vmul.f32 %v511_v3, %v256_v42 }
 0x162   : > { %v1450_v0 = vpop.xlane.xlu1 %294 }
 0x164   : > { %v515_v5 = vpop.xlane.xlu0 %514 }
 0x166   : > { %v509_v2 = vpop.xlane.xlu1 %508 }
 0x167   : > { %v587_v23 = vmul.f32 %v509_v2, %v253_v55  ;;  %v590_v2 = vmul.f32 %v515_v5, %v1434_v56 }
 0x168   : > { %v1454_v7 = vpop.xlane.xlu0 %518 }
 0x16a   : > { %v513_v4 = vpop.xlane.xlu1 %512 }
 0x16b   : > { %v589_v50 = vmul.f32 %v513_v4, %v259_v29 }
 0x16c   : > { %v523_v9 = vpop.xlane.xlu0 %522 }
 0x16d   : > { %v594_v24 = vmul.f32 %v523_v9, %v274_v30 }
 0x16e   : > { %v1452_v6 = vpop.xlane.xlu1 %516 }
 0x170   : > { %v527_v11 = vpop.xlane.xlu0 %526 }
 0x171   : > { %v596_v26 = vmul.f32 %v527_v11, %v280_v45 }
 0x172   : > { %v1456_v8 = vpop.xlane.xlu1 %520 }
 0x174   : > { %v531_v13 = vpop.xlane.xlu0 %530 }
 0x175   : > { %v598_v56 = vmul.f32 %v531_v13, %v1444_v62 }
 0x176   : > { %v525_v10 = vpop.xlane.xlu1 %524 }
 0x177   : > { %v595_v36 = vmul.f32 %v525_v10, %v277_v60  ;;  %v637_v60 = vld [vmem:[#allocation2 + $0x18] sm:$0xff] }
 0x178   : > { %v1460_v15 = vpop.xlane.xlu0 %534 }
 0x17a   : > { %v529_v12 = vpop.xlane.xlu1 %528 }
 0x17b   : > { %v597_v3 = vmul.f32 %v529_v12, %v1442_v61 }
 0x17e   : > { %v1458_v14 = vpop.xlane.xlu1 %532 }
 0x182   : > { %v1462_v17 = vpop.xlane.xlu1 %536 }
 0x1bb   : > { %v555_v18 = vpop.xlane.xlu0 %554 }
 0x1bc   : > { %v602_v19 = vsub.f32 %v586_v16, %v555_v18 }
 0x1be   : > { %v618_v21 = vmul.f32 3.0517579e-06, %v602_v19  ;;  %v645_v19 = vld [vmem:[#allocation2 + $0x58] sm:$0xff] }
 0x1bf   : > { %v557_v27 = vpop.xlane.xlu1 %556  ;;  %v571_v28 = vpop.xlane.xlu0 %570 }
 0x1c0   : > { %v650_v31 = vadd.f32 %v634_v20, %v618_v21  ;;  %v603_v32 = vsub.f32 %v587_v23, %v557_v27  ;;  %v610_v33 = vsub.f32 %v594_v24, %v571_v28  ;;  %v638_v20 = vld [vmem:[#allocation2 + $0x20] sm:$0xff]  ;;  %v591_v23 = vmul.f32 %v1452_v6, %v1436_v57 }
 0x1c1   : > { %v599_v57 = vmul.f32 %v1458_v14, %v1446_v46  ;;  %v600_v46 = vmul.f32 %v1460_v15, %v1448_v63 }
 0x1c2   : > { %667 = vst.msk [vmem:[#allocation2] sm:$0xff] %vm666_vm1, %v650_v31  ;;  %v619_v37 = vmul.f32 3.0517579e-06, %v603_v32  ;;  %v626_v39 = vmul.f32 3.0517579e-06, %v610_v33  ;;  %v639_v32 = vld [vmem:[#allocation2 + $0x28] sm:$0xff] }
 0x1c3   : > { %v573_v40 = vpop.xlane.xlu1 %572  ;;  %v559_v38 = vpop.xlane.xlu0 %558  ;;  %v646_v33 = vld [vmem:[#allocation2 + $0x60] sm:$0xff] }
 0x1c4   : > { %v651_v43 = vadd.f32 %v635_v22, %v619_v37  ;;  %v658_v25 = vadd.f32 %v642_v34, %v626_v39  ;;  %v611_v44 = vsub.f32 %v595_v36, %v573_v40  ;;  %v604_v47 = vsub.f32 %v588_v35, %v559_v38  ;;  %v647_v40 = vld [vmem:[#allocation2 + $0x68] sm:$0xff]  ;;  %v640_v38 = vld [vmem:[#allocation2 + $0x30] sm:$0xff] }
 0x1c5   : > { %v592_v22 = vmul.f32 %v1454_v7, %v1438_v58  ;;  %v593_v58 = vmul.f32 %v1456_v8, %v1440_v59  ;;  %v601_v59 = vmul.f32 %v1462_v17, %v1450_v0 }
 0x1c6   : > { %668 = vst.msk [vmem:[#allocation2 + $0x8] sm:$0xff] %vm666_vm1, %v651_v43  ;;  %675 = vst.msk [vmem:[#allocation2 + $0x40] sm:$0xff] %vm666_vm1, %v658_v25  ;;  %v627_v51 = vmul.f32 3.0517579e-06, %v611_v44  ;;  %v620_v41 = vmul.f32 3.0517579e-06, %v604_v47 }
 0x1c7   : > { %v561_v52 = vpop.xlane.xlu1 %560  ;;  %v575_v53 = vpop.xlane.xlu0 %574 }
 0x1c8   : > { %v659_v54 = vadd.f32 %v643_v48, %v627_v51  ;;  %v652_v42 = vadd.f32 %v636_v49, %v620_v41  ;;  %v605_v55 = vsub.f32 %v589_v50, %v561_v52  ;;  %v612_v30 = vsub.f32 %v596_v26, %v575_v53  ;;  %v641_v50 = vld [vmem:[#allocation2 + $0x38] sm:$0xff]  ;;  %v648_v26 = vld [vmem:[#allocation2 + $0x70] sm:$0xff] }
 0x1c9   : > { %v649_v53 = vld [vmem:[#allocation2 + $0x78] sm:$0xff] }
 0x1ca   : > { %676 = vst.msk [vmem:[#allocation2 + $0x48] sm:$0xff] %vm666_vm1, %v659_v54  ;;  %669 = vst.msk [vmem:[#allocation2 + $0x10] sm:$0xff] %vm666_vm1, %v652_v42  ;;  %v621_v29 = vmul.f32 3.0517579e-06, %v605_v55  ;;  %v628_v45 = vmul.f32 3.0517579e-06, %v612_v30 }
 0x1cb   : > { %v577_v4 = vpop.xlane.xlu1 %576  ;;  %v563_v9 = vpop.xlane.xlu0 %562 }
 0x1cc   : > { %v653_v10 = vadd.f32 %v637_v60, %v621_v29  ;;  %v660_v11 = vadd.f32 %v644_v1, %v628_v45  ;;  %v613_v16 = vsub.f32 %v597_v3, %v577_v4  ;;  %v606_v18 = vsub.f32 %v590_v2, %v563_v9 }
 0x1ce   : > { %670 = vst.msk [vmem:[#allocation2 + $0x18] sm:$0xff] %vm666_vm1, %v653_v10  ;;  %677 = vst.msk [vmem:[#allocation2 + $0x50] sm:$0xff] %vm666_vm1, %v660_v11  ;;  %v629_v61 = vmul.f32 3.0517579e-06, %v613_v16  ;;  %v622_v5 = vmul.f32 3.0517579e-06, %v606_v18 }
 0x1cf   : > { %v565_v12 = vpop.xlane.xlu1 %564  ;;  %v579_v24 = vpop.xlane.xlu0 %578 }
 0x1d0   : > { %v661_v21 = vadd.f32 %v645_v19, %v629_v61  ;;  %v654_v27 = vadd.f32 %v638_v20, %v622_v5  ;;  %v607_v28 = vsub.f32 %v591_v23, %v565_v12  ;;  %v614_v31 = vsub.f32 %v598_v56, %v579_v24 }
 0x1d2   : > { %678 = vst.msk [vmem:[#allocation2 + $0x58] sm:$0xff] %vm666_vm1, %v661_v21  ;;  %671 = vst.msk [vmem:[#allocation2 + $0x20] sm:$0xff] %vm666_vm1, %v654_v27  ;;  %v623_v62 = vmul.f32 3.0517579e-06, %v607_v28  ;;  %v630_v6 = vmul.f32 3.0517579e-06, %v614_v31 }
 0x1d3   : > { %v581_v13 = vpop.xlane.xlu1 %580  ;;  %v567_v34 = vpop.xlane.xlu0 %566 }
 0x1d4   : > { %v655_v35 = vadd.f32 %v639_v32, %v623_v62  ;;  %v662_v36 = vadd.f32 %v646_v33, %v630_v6  ;;  %v615_v37 = vsub.f32 %v599_v57, %v581_v13  ;;  %v608_v39 = vsub.f32 %v592_v22, %v567_v34 }
 0x1d6   : > { %672 = vst.msk [vmem:[#allocation2 + $0x28] sm:$0xff] %vm666_vm1, %v655_v35  ;;  %679 = vst.msk [vmem:[#allocation2 + $0x60] sm:$0xff] %vm666_vm1, %v662_v36  ;;  %v631_v7 = vmul.f32 3.0517579e-06, %v615_v37  ;;  %v624_v14 = vmul.f32 3.0517579e-06, %v608_v39 }
 0x1d7   : > { %v569_v43 = vpop.xlane.xlu1 %568  ;;  %v583_v25 = vpop.xlane.xlu0 %582 }
 0x1d8   : > { %v663_v44 = vadd.f32 %v647_v40, %v631_v7  ;;  %v656_v47 = vadd.f32 %v640_v38, %v624_v14  ;;  %v609_v48 = vsub.f32 %v593_v58, %v569_v43  ;;  %v616_v49 = vsub.f32 %v600_v46, %v583_v25 }
 0x1da   : > { %680 = vst.msk [vmem:[#allocation2 + $0x68] sm:$0xff] %vm666_vm1, %v663_v44  ;;  %673 = vst.msk [vmem:[#allocation2 + $0x30] sm:$0xff] %vm666_vm1, %v656_v47  ;;  %v625_v63 = vmul.f32 3.0517579e-06, %v609_v48  ;;  %v632_v8 = vmul.f32 3.0517579e-06, %v616_v49 }
 0x1db   : > { %v585_v15 = vpop.xlane.xlu1 %584 }
 0x1dc   : > { %v657_v51 = vadd.f32 %v641_v50, %v625_v63  ;;  %v664_v41 = vadd.f32 %v648_v26, %v632_v8  ;;  %v617_v52 = vsub.f32 %v601_v59, %v585_v15 }
 0x1de   : > { %674 = vst.msk [vmem:[#allocation2 + $0x38] sm:$0xff] %vm666_vm1, %v657_v51  ;;  %681 = vst.msk [vmem:[#allocation2 + $0x70] sm:$0xff] %vm666_vm1, %v664_v41  ;;  %v633_v54 = vmul.f32 3.0517579e-06, %v617_v52  ;;  %686 = sbr.rel (%p844_p1) target bundleno = 717 (0x2cd), region = 44 }
 0x1e0   : > { %v665_v42 = vadd.f32 %v649_v53, %v633_v54 }
 0x1e2   : > { %682 = vst.msk [vmem:[#allocation2 + $0x78] sm:$0xff] %vm666_vm1, %v665_v42 }
 0x1e3   : > { %v687_v0 = vld [vmem:[#allocation2] sm:$0xff]  ;;  %v688_v17 = vld [vmem:[#allocation2 + $0x8] sm:$0xff]  ;;  %v689_v55 = vld [vmem:[#allocation2 + $0x10] sm:$0xff] }
 0x1e4   : > { %v690_v30 = vld [vmem:[#allocation2 + $0x18] sm:$0xff]  ;;  %v703_v60 = vsel %vm666_vm1, %v687_v0, 0.0  ;;  %v704_v1 = vsel %vm666_vm1, %v688_v17, 0.0  ;;  %v706_v2 = vsel %vm666_vm1, %v689_v55, 0.0  ;;  %v691_v3 = vld [vmem:[#allocation2 + $0x20] sm:$0xff]  ;;  %v692_v4 = vld [vmem:[#allocation2 + $0x28] sm:$0xff] }
 0x1e5   : > { %v705_v29 = vadd.f32 %v704_v1, %v703_v60  ;;  %v708_v45 = vsel %vm666_vm1, %v690_v30, 0.0  ;;  %v710_v10 = vsel %vm666_vm1, %v691_v3, 0.0  ;;  %v693_v11 = vld [vmem:[#allocation2 + $0x30] sm:$0xff]  ;;  %v712_v18 = vsel %vm666_vm1, %v692_v4, 0.0  ;;  %v694_v19 = vld [vmem:[#allocation2 + $0x38] sm:$0xff]  ;;  %v695_v56 = vld [vmem:[#allocation2 + $0x40] sm:$0xff] }
 0x1e6   : > { %v714_v23 = vsel %vm666_vm1, %v693_v11, 0.0  ;;  %v716_v5 = vsel %vm666_vm1, %v694_v19, 0.0  ;;  %v696_v12 = vld [vmem:[#allocation2 + $0x48] sm:$0xff]  ;;  %v718_v21 = vsel %vm666_vm1, %v695_v56, 0.0  ;;  %v697_v27 = vld [vmem:[#allocation2 + $0x50] sm:$0xff]  ;;  %v698_v32 = vld [vmem:[#allocation2 + $0x58] sm:$0xff] }
 0x1e7   : > { %v707_v9 = vadd.f32 %v706_v2, %v705_v29  ;;  %v720_v31 = vsel %vm666_vm1, %v696_v12, 0.0  ;;  %v722_v22 = vsel %vm666_vm1, %v697_v27, 0.0  ;;  %v699_v57 = vld [vmem:[#allocation2 + $0x60] sm:$0xff]  ;;  %v724_v6 = vsel %vm666_vm1, %v698_v32, 0.0  ;;  %v700_v13 = vld [vmem:[#allocation2 + $0x68] sm:$0xff]  ;;  %v701_v36 = vld [vmem:[#allocation2 + $0x70] sm:$0xff] }
 0x1e8   : > { %v726_v35 = vsel %vm666_vm1, %v699_v57, 0.0  ;;  %v728_v39 = vsel %vm666_vm1, %v700_v13, 0.0  ;;  %v730_v58 = vsel %vm666_vm1, %v701_v36, 0.0 }
 0x1e9   : > { %v709_v16 = vadd.f32 %v708_v45, %v707_v9  ;;  %v702_v40 = vld [vmem:[#allocation2 + $0x78] sm:$0xff] }
 0x1ea   : > { %v732_v7 = vsel %vm666_vm1, %v702_v40, 0.0 }
 0x1eb   : > { %v711_v20 = vadd.f32 %v710_v10, %v709_v16 }
 0x1ed   : > { %v713_v61 = vadd.f32 %v712_v18, %v711_v20 }
 0x1ef   : > { %v715_v24 = vadd.f32 %v714_v23, %v713_v61 }
 0x1f1   : > { %v717_v28 = vadd.f32 %v716_v5, %v715_v24 }
 0x1f3   : > { %v719_v33 = vadd.f32 %v718_v21, %v717_v28 }
 0x1f5   : > { %v721_v62 = vadd.f32 %v720_v31, %v719_v33 }
 0x1f7   : > { %v723_v34 = vadd.f32 %v722_v22, %v721_v62 }
 0x1f9   : > { %v725_v37 = vadd.f32 %v724_v6, %v723_v34 }
 0x1fb   : > { %v727_v38 = vadd.f32 %v726_v35, %v725_v37 }
 0x1fd   : > { %v729_v46 = vadd.f32 %v728_v39, %v727_v38 }
 0x1ff   : > { %v731_v14 = vadd.f32 %v730_v58, %v729_v46 }
 0x201   : > { %v733_v43 = vadd.f32 %v732_v7, %v731_v14 }
 0x203   : > { %734 = vadd.xlane.f32.xlu0 %v733_v43 }
 0x28c   : > { %v735_v25 = vpop.xlane.xlu0 %734 }
 0x28d   : > { %v736_v44 = vrot.slane %v735_v25, 4 }
 0x28f   : > { %v737_v47 = vadd.f32 %v736_v44, %v735_v25 }
 0x291   : > { %v738_v48 = vrot.slane %v737_v47, 2 }
 0x293   : > { %v739_v49 = vadd.f32 %v738_v48, %v737_v47 }
 0x295   : > { %v740_v50 = vrot.slane %v739_v49, 1 }
 0x297   : > { %v741_v26 = vadd.f32 %v740_v50, %v739_v49 }
 0x299   : > { %963 = vpush %v741_v26 }
 0x2ca   : > { %s964_s12 = spop %963 }
 0x2cb   : > { %v743_v59 = vstv %s964_s12 }
 0x2cc   : > { %744 = vst [vmem:[#allocation8] sm:$0xff] %v743_v59 }
 0x2cd PF: > { %p1514_p4 = scmp.eq.s32.totalorder %s831_s15, 1  ;;  %s1188_s6 = smov [#allocation8]  }
 0x2ce   : > { %s754_s7 = sshll.u32 %s1188_s6, 4  ;;  %s755_s7 = int_to_ptr.vmem [resolvable:$true] %s754_s7 }
 0x2cf   : > { %s1097_s8 = scalar_lea.vmem %s755_s7, 128  ;;  %p1104_p12 = scmp.lt.s32.totalorder %s755_s7, %s755_s7 }
 0x2d0   : > { %p1098_p10 = scmp.ne.s32.totalorder %s755_s7, %s1097_s8  ;;  %p1105_p13 = scmp.lt.s32.totalorder %s1097_s8, %s1097_s8 }
 0x2d2   : > { %p1099_p11 = pnand %p1098_p10, %p1514_p4  ;;  %p1106_p0 = por %p1105_p13, %p1104_p12 }
 0x2d4   : > { %p1100_p7 = pneg %p1099_p11 }
 0x2d6   : > { %p1107_p2 = pnand %p1106_p0, %p1100_p7 }
 0x2d8   : > { %1110 = shalt.err (!%p1107_p2)
}
 0x2d9   : > { %972 = dma.vmem_to_hbm [thread:$0]  (%p1514_p4), %s755_s7, 128, %s1549_s2, [#allocation5]  }
 0x2da   : > { %1154 = dma.done.wait (%p1514_p4), [#allocation5], 128  }
 0x2db   : > { %1156 = vsyncadd (%p1514_p4), [#allocation5], 4294967168 }
 0x2dc PF: > { %s17_s14 = sadd.s32 1, %s1179_s14   ;;  %s1556_s9 = smov %s1163_s10 }
 0x2dd   : > { %p14_p3 = scmp.ge.s32.totalorder %s17_s14, 4   ;;  %s1557_s10 = smov %s1167_s11 }
 0x2de   : > { %s1558_s11 = smov %s1280_s5  ;;  %s1559_s12 = smov %s1175_s13 }
 0x2df   : > { %s1560_s13 = smov %s1562_s22  ;;  %16 = sbr.rel (!%p14_p3) target bundleno = 6 (0x6), region = 79 }
 0x2e4   :  { %767 = vsyncpa [#allocation4], 1 }
 0x2e5   :  { %769 = vsyncpa [#allocation4 + $0x1], 1 }
 0x2e6   :  { %770 = vsyncpa [#allocation7], 1 }
 0x2e7   :  { %771 = vsyncpa [#allocation5], 1 }
 0x2e8   :  { %773 = vsyncpa [#allocation5 + $0x1], 1 }

</bundles_post_ra>
